<compile_context>
chip_gen: v6e
topology: v6e:2x2x1
jax: 0.10.0
libtpu: 0.0.40
codegen_flags: <defaults>
</compile_context>

<pallas_src>
from functools import partial

import jax
import jax.numpy as jnp
from jax import lax
from jax.experimental import pallas as pl
from jax.experimental.pallas import tpu as pltpu


def _round_up(x, m):
    return ((x + m - 1) // m) * m


def _ae_kernel(x_ref, we_ref, wdt_ref, be_ref, bd_ref,      # inputs
               enc_ref, sq_ref, l1p_ref,                    # outputs
               rec_acc, l1_acc,                             # scratch
               *, batch, tb, tm, ragged):
    bi = pl.program_id(0)
    mi = pl.program_id(1)
    nm = pl.num_programs(1)

    # ---- encode this m-stripe: relu(x @ W_enc[:, mt] + b_enc[mt]) on the MXU (f32 acc) ----
    pre = jnp.dot(x_ref[...], we_ref[...], preferred_element_type=jnp.float32)
    pre = pre + be_ref[...].astype(jnp.float32)             # single hoisted (1, tm) broadcast
    enc_bf16 = jnp.maximum(pre, 0.0).astype(jnp.bfloat16)
    enc_ref[...] = enc_bf16                                  # lane-dense (tb, tm) bf16 store

    # ---- L1 partial on the returned bf16 latents (relu output >= 0, so |.| is identity) ----
    enc_loss = enc_bf16.astype(jnp.float32)
    if ragged:                                               # traced only if last tile is padded
        row_ids = lax.broadcasted_iota(jnp.int32, (tb, 1), 0)
        valid = jnp.minimum(batch - bi * tb, tb)
        enc_loss = jnp.where(row_ids < valid, enc_loss, 0.0)
    # Layout-preserving split of the row axis; the leading-axis reduce is vreg-wise VALU
    # adds only (no cross-lane XLU reduce, no SMEM scalar sync per step).
    l1_stripe = jnp.sum(enc_loss.reshape(tb // 8, 8, tm), axis=0)

    # ---- decode partial: enc @ W_dec^T[mt, :]  (canonical contraction over m) ----
    rec_stripe = jnp.dot(enc_bf16, wdt_ref[...], preferred_element_type=jnp.float32)

    @pl.when(mi == 0)
    def _first():                    # first stripe writes directly -> no zero-fill pass
        rec_acc[...] = rec_stripe
        l1_acc[...] = l1_stripe

    @pl.when(mi != 0)
    def _rest():
        rec_acc[...] += rec_stripe
        l1_acc[...] += l1_stripe

    @pl.when(mi == nm - 1)
    def _finalize():
        rec = rec_acc[...] + bd_ref[...].astype(jnp.float32)
        diff = x_ref[...].astype(jnp.float32) - rec
        if ragged:
            row_ids = lax.broadcasted_iota(jnp.int32, (tb, 1), 0)
            valid = jnp.minimum(batch - bi * tb, tb)
            diff = jnp.where(row_ids < valid, diff, 0.0)
        sq = jnp.sum(diff * diff)
        sq_ref[...] = jnp.broadcast_to(sq, sq_ref.shape)
        l1p_ref[...] = jnp.broadcast_to(jnp.sum(l1_acc[...]), l1p_ref.shape)


def autoencoder_forward(x, w_enc, w_dec, b_enc, b_dec, lam, *, tb=None, tm=None):
    """AutoEncoder.forward.

    x: [B, n_dim] bf16; w_enc, w_dec: [n_dim, m_dim] bf16 (module layout); biases bf16.
    Returns (encoded [B, m_dim] bf16, loss, l1, mse).
    """
    B, n_dim = x.shape
    m_dim = w_enc.shape[1]
    assert w_enc.shape == (n_dim, m_dim) and w_dec.shape == (n_dim, m_dim)
    assert b_enc.shape == (m_dim,) and b_dec.shape == (n_dim,)
    assert m_dim % 128 == 0, "m_dim must be a multiple of 128"

    # --- physical VMEM: drives default tile sizes and the scoped-VMEM cap ---
    try:
        phys_vmem = int(pltpu.get_tpu_info().vmem_capacity_bytes)
    except Exception:
        phys_vmem = 64 << 20                      # conservative (v7x-sized) fallback

    # --- tiling: large batch tile so weight re-streaming per batch tile is amortized ---
    big_vmem = phys_vmem >= (96 << 20)            # v5e / v6e (128 MiB) vs v7x (64 MiB)
    if tb is None:
        tb = 768 if big_vmem else 512
    if tm is None:
        tm = 1024 if big_vmem else 512
    tm = min(tm, m_dim)
    while m_dim % tm:
        tm -= 128
    tb = min(tb, _round_up(B, 128))               # MXU-granule clamp for small batches
    assert tb % 8 == 0 and tm % 128 == 0

    nb = pl.cdiv(B, tb)
    nm = m_dim // tm
    B_pad = nb * tb
    ragged = (B_pad != B)

    x_p = x if not ragged else jnp.pad(x, ((0, B_pad - B), (0, 0)))
    w_dec_t = w_dec.T                             # one-time [m_dim, n_dim] layout for decode
    be = b_enc.reshape(1, m_dim)
    bd = b_dec.reshape(1, n_dim)

    # --- VMEM budget (double buffering already counted once; headroom; capped < physical) ---
    need = (
        2 * tb * n_dim * 2                        # x tile, double-buffered (bf16)
        + 2 * n_dim * tm * 2                      # W_enc stripe, double-buffered
        + 2 * tm * n_dim * 2                      # W_dec^T stripe, double-buffered
        + 2 * (tm + n_dim) * 2                    # biases
        + 2 * tb * tm * 2                         # encoded output tile, double-buffered
        + tb * n_dim * 4                          # f32 reconstruction accumulator
        + 8 * tm * 4                              # f32 L1 accumulator
        + 4 * 8 * 128 * 4                         # partial-sum outputs
    )
    vmem_limit = int(min(max(need + (4 << 20), 16 << 20), phys_vmem - (8 << 20)))

    grid_spec = pltpu.PrefetchScalarGridSpec(
        num_scalar_prefetch=0,
        grid=(nb, nm),
        in_specs=[
            pl.BlockSpec((tb, n_dim), lambda bi, mi: (bi, 0)),    # x (resident over m)
            pl.BlockSpec((n_dim, tm), lambda bi, mi: (0, mi)),    # W_enc stripe
            pl.BlockSpec((tm, n_dim), lambda bi, mi: (mi, 0)),    # W_dec^T stripe (contiguous)
            pl.BlockSpec((1, tm),     lambda bi, mi: (0, mi)),    # b_enc stripe
            pl.BlockSpec((1, n_dim),  lambda bi, mi: (0, 0)),     # b_dec (resident)
        ],
        out_specs=(
            pl.BlockSpec((tb, tm),    lambda bi, mi: (bi, mi)),   # encoded
            pl.BlockSpec((1, 8, 128), lambda bi, mi: (bi, 0, 0)), # per-tile sum((x-rec)^2)
            pl.BlockSpec((1, 8, 128), lambda bi, mi: (bi, 0, 0)), # per-tile sum(|enc|)
        ),
        scratch_shapes=[
            pltpu.VMEM((tb, n_dim), jnp.float32),                 # reconstruction accumulator
            pltpu.VMEM((8, tm), jnp.float32),                     # vectorized L1 accumulator
        ],
    )

    enc_p, sq_part, l1_part = pl.pallas_call(
        partial(_ae_kernel, batch=B, tb=tb, tm=tm, ragged=ragged),
        out_shape=(
            jax.ShapeDtypeStruct((B_pad, m_dim), jnp.bfloat16),
            jax.ShapeDtypeStruct((nb, 8, 128), jnp.float32),
            jax.ShapeDtypeStruct((nb, 8, 128), jnp.float32),
        ),
        grid_spec=grid_spec,
        compiler_params=pltpu.CompilerParams(
            dimension_semantics=("parallel", "arbitrary"),
            vmem_limit_bytes=vmem_limit,
        ),
    )(x_p, w_enc, w_dec_t, be, bd)

    # tiny final reductions in the wrapper keep the batch grid axis parallel across cores
    mse = jnp.sum(sq_part[:, 0, 0]) / jnp.float32(B * n_dim)
    l1 = jnp.sum(l1_part[:, 0, 0]) / jnp.float32(B)
    loss = jnp.float32(lam) * l1 + mse
    enc = enc_p if not ragged else enc_p[:B]
    return enc, loss, l1, mse


def init_params(key, n_dim, m_dim):
    """Deterministic init mirroring AutoEncoder.__init__ (untied; W_enc == decoder.weight at init)."""
    w = jax.random.uniform(key, (n_dim, m_dim), dtype=jnp.float32)   # ~ torch.rand
    w = 0.1 * w / jnp.linalg.norm(w, axis=0, keepdims=True)          # norm over dim=0
    decoder_w = w.astype(jnp.bfloat16)                               # decoder.weight [n, m]
    w_enc = decoder_w                                                # encoder.weight.T at init
    b_enc = jnp.zeros((m_dim,), dtype=jnp.bfloat16)
    b_dec = jnp.zeros((n_dim,), dtype=jnp.bfloat16)
    return w_enc, decoder_w, b_enc, b_dec


if __name__ == "__main__":
    B, n_dim, m_dim = 100, 256, 512          # small demo shapes; B not a tile multiple on purpose
    lam = 1e-3

    key = jax.random.PRNGKey(0)
    k_w, k_x, k_be, k_bd = jax.random.split(key, 4)

    w_enc, w_dec, b_enc, b_dec = init_params(k_w, n_dim, m_dim)
    # non-zero biases (as after training) to exercise the padded-row masking path
    b_enc = (0.05 * jax.random.normal(k_be, (m_dim,))).astype(jnp.bfloat16)
    b_dec = (0.05 * jax.random.normal(k_bd, (n_dim,))).astype(jnp.bfloat16)
    x = jax.random.normal(k_x, (B, n_dim), dtype=jnp.float32).astype(jnp.bfloat16)

    # ---- pure-JAX reference ----
    xf = x.astype(jnp.float32)
    wef = w_enc.astype(jnp.float32)
    wdf = w_dec.astype(jnp.float32)
    enc_ref = jnp.maximum(xf @ wef + b_enc.astype(jnp.float32), 0.0).astype(jnp.bfloat16)
    rec_ref = enc_ref.astype(jnp.float32) @ wdf.T + b_dec.astype(jnp.float32)
    mse_ref = jnp.mean(jnp.mean((xf - rec_ref) ** 2, axis=-1))
    l1_ref = jnp.mean(jnp.sum(jnp.abs(enc_ref.astype(jnp.float32)), axis=-1))
    loss_ref = lam * l1_ref + mse_ref

    # small tiles: exercises a (2, 2) grid with a ragged, masked last batch tile
    enc, loss, l1, mse = autoencoder_forward(x, w_enc, w_dec, b_enc, b_dec, lam, tb=64, tm=256)
    jax.block_until_ready((enc, loss, l1, mse))

    assert enc.shape == (B, m_dim) and enc.dtype == jnp.bfloat16
    assert jnp.allclose(enc.astype(jnp.float32), enc_ref.astype(jnp.float32),
                        atol=2e-2, rtol=2e-2)
    assert jnp.allclose(mse, mse_ref, rtol=2e-2, atol=1e-3)
    assert jnp.allclose(l1, l1_ref, rtol=2e-2, atol=1e-1)
    assert jnp.allclose(loss, loss_ref, rtol=2e-2, atol=1e-1)

    # default (large-tile) path: nm == 1 (init + finalize in same step), padded batch tile
    enc2, loss2, l1_2, mse2 = autoencoder_forward(x, w_enc, w_dec, b_enc, b_dec, lam)
    jax.block_until_ready((enc2, loss2, l1_2, mse2))
    assert jnp.allclose(enc2.astype(jnp.float32), enc_ref.astype(jnp.float32),
                        atol=2e-2, rtol=2e-2)
    assert jnp.allclose(mse2, mse_ref, rtol=2e-2, atol=1e-3)
    assert jnp.allclose(l1_2, l1_ref, rtol=2e-2, atol=1e-1)
    assert jnp.allclose(loss2, loss_ref, rtol=2e-2, atol=1e-1)

    print("KERNEL_OK")
</pallas_src>

<mosaic_0001>
module attributes {stable_mosaic.version = 11 : i64} {
  func.func @_ae_kernel(%arg0: i32, %arg1: i32, %arg2: memref<64x256xbf16, #tpu.memory_space<vmem>>, %arg3: memref<256x256xbf16, #tpu.memory_space<vmem>>, %arg4: memref<256x256xbf16, #tpu.memory_space<vmem>>, %arg5: memref<1x256xbf16, #tpu.memory_space<vmem>>, %arg6: memref<1x256xbf16, #tpu.memory_space<vmem>>, %arg7: memref<64x256xbf16, #tpu.memory_space<vmem>>, %arg8: memref<1x8x128xf32, #tpu.memory_space<vmem>>, %arg9: memref<1x8x128xf32, #tpu.memory_space<vmem>>, %arg10: memref<64x256xf32, #tpu.memory_space<vmem>>, %arg11: memref<8x256xf32, #tpu.memory_space<vmem>>) attributes {dimension_semantics = [#tpu.dimension_semantics<parallel>, #tpu.dimension_semantics<arbitrary>], iteration_bounds = array<i64: 2, 2>, scalar_prefetch = 0 : i64, scratch_operands = 2 : i64, tpu.core_type = #tpu.core_type<tc>, window_params = [{transform_indices = @transform_0, window_bounds = array<i64: 64, 256>}, {transform_indices = @transform_1, window_bounds = array<i64: 256, 256>}, {transform_indices = @transform_2, window_bounds = array<i64: 256, 256>}, {transform_indices = @transform_3, window_bounds = array<i64: 1, 256>}, {pipeline_mode = #tpu.pipeline_mode<synchronous>, transform_indices = @transform_4, window_bounds = array<i64: 1, 256>}, {transform_indices = @transform_5, window_bounds = array<i64: 64, 256>}, {transform_indices = @transform_6, window_bounds = array<i64: 1, 8, 128>}, {transform_indices = @transform_7, window_bounds = array<i64: 1, 8, 128>}]} {
    %c0 = arith.constant 0 : index
    %c0_0 = arith.constant 0 : index
    %0 = vector.load %arg2[%c0, %c0_0] : memref<64x256xbf16, #tpu.memory_space<vmem>>, vector<64x256xbf16>
    %c0_1 = arith.constant 0 : index
    %c0_2 = arith.constant 0 : index
    %1 = vector.load %arg3[%c0_1, %c0_2] : memref<256x256xbf16, #tpu.memory_space<vmem>>, vector<256x256xbf16>
    %cst = arith.constant dense<0.000000e+00> : vector<64x256xf32>
    %2 = tpu.matmul %0, %1, %cst {dimension_numbers = #tpu.dot_dimension_numbers<[1], [0], [0], [1], [0, 0, 1, 1], [], []>} : vector<64x256xbf16>, vector<256x256xbf16>, vector<64x256xf32> -> vector<64x256xf32>
    %c0_3 = arith.constant 0 : index
    %c0_4 = arith.constant 0 : index
    %3 = vector.load %arg5[%c0_3, %c0_4] : memref<1x256xbf16, #tpu.memory_space<vmem>>, vector<1x256xbf16>
    %4 = arith.extf %3 : vector<1x256xbf16> to vector<1x256xf32>
    %5 = vector.broadcast %4 : vector<1x256xf32> to vector<64x256xf32>
    %6 = arith.addf %2, %5 : vector<64x256xf32>
    %cst_5 = arith.constant 0.000000e+00 : f32
    %7 = vector.broadcast %cst_5 : f32 to vector<64x256xf32>
    %8 = arith.maximumf %6, %7 : vector<64x256xf32>
    %9 = arith.truncf %8 : vector<64x256xf32> to vector<64x256xbf16>
    %c0_6 = arith.constant 0 : index
    %c0_7 = arith.constant 0 : index
    %10 = vector.load %arg7[%c0_6, %c0_7] : memref<64x256xbf16, #tpu.memory_space<vmem>>, vector<64x256xbf16>
    tpu.vector_store %arg7[%c0_6, %c0_7], %9 {strides = array<i32>} : memref<64x256xbf16, #tpu.memory_space<vmem>>, vector<64x256xbf16>,
    %11 = arith.extf %9 : vector<64x256xbf16> to vector<64x256xf32>
    %12 = tpu.iota {dimensions = array<i32: 0>} : vector<64x1xi32>
    %c64_i32 = arith.constant 64 : i32
    %13 = arith.muli %arg0, %c64_i32 : i32
    %c100_i32 = arith.constant 100 : i32
    %14 = arith.subi %c100_i32, %13 : i32
    %c64_i32_8 = arith.constant 64 : i32
    %15 = arith.minsi %14, %c64_i32_8 : i32
    %16 = vector.broadcast %15 : i32 to vector<64x1xi32>
    %17 = arith.cmpi slt, %12, %16 : vector<64x1xi32>
    %cst_9 = arith.constant 0.000000e+00 : f32
    %18 = vector.shape_cast %17 : vector<64x1xi1> to vector<64x1xi1>
    %19 = vector.broadcast %18 : vector<64x1xi1> to vector<64x256xi1>
    %20 = vector.broadcast %cst_9 : f32 to vector<64x256xf32>
    %21 = arith.select %19, %11, %20 : vector<64x256xi1>, vector<64x256xf32>
    %22 = vector.shape_cast %21 : vector<64x256xf32> to vector<8x8x256xf32>
    %cst_10 = arith.constant dense<0.000000e+00> : vector<8x256xf32>
    %23 = vector.multi_reduction <add>, %22, %cst_10 [0] : vector<8x8x256xf32> to vector<8x256xf32>
    %c0_11 = arith.constant 0 : index
    %c0_12 = arith.constant 0 : index
    %24 = vector.load %arg4[%c0_11, %c0_12] : memref<256x256xbf16, #tpu.memory_space<vmem>>, vector<256x256xbf16>
    %cst_13 = arith.constant dense<0.000000e+00> : vector<64x256xf32>
    %25 = tpu.matmul %9, %24, %cst_13 {dimension_numbers = #tpu.dot_dimension_numbers<[1], [0], [0], [1], [0, 0, 1, 1], [], []>} : vector<64x256xbf16>, vector<256x256xbf16>, vector<64x256xf32> -> vector<64x256xf32>
    %c0_i32 = arith.constant 0 : i32
    %26 = arith.cmpi eq, %arg1, %c0_i32 : i32
    %27 = arith.extui %26 : i1 to i32
    %c0_i32_14 = arith.constant 0 : i32
    %28 = arith.cmpi ne, %27, %c0_i32_14 : i32
    scf.if %28 {
      %c0_18 = arith.constant 0 : index
      %c0_19 = arith.constant 0 : index
      %35 = vector.load %arg10[%c0_18, %c0_19] : memref<64x256xf32, #tpu.memory_space<vmem>>, vector<64x256xf32>
      tpu.vector_store %arg10[%c0_18, %c0_19], %25 {strides = array<i32>} : memref<64x256xf32, #tpu.memory_space<vmem>>, vector<64x256xf32>,
      %c0_20 = arith.constant 0 : index
      %c0_21 = arith.constant 0 : index
      %36 = vector.load %arg11[%c0_20, %c0_21] : memref<8x256xf32, #tpu.memory_space<vmem>>, vector<8x256xf32>
      tpu.vector_store %arg11[%c0_20, %c0_21], %23 {strides = array<i32>} : memref<8x256xf32, #tpu.memory_space<vmem>>, vector<8x256xf32>,
    } else {
    }
    %c0_i32_15 = arith.constant 0 : i32
    %29 = arith.cmpi ne, %arg1, %c0_i32_15 : i32
    %30 = arith.extui %29 : i1 to i32
    %c0_i32_16 = arith.constant 0 : i32
    %31 = arith.cmpi ne, %30, %c0_i32_16 : i32
    scf.if %31 {
      %c0_18 = arith.constant 0 : index
      %c0_19 = arith.constant 0 : index
      %35 = vector.load %arg10[%c0_18, %c0_19] : memref<64x256xf32, #tpu.memory_space<vmem>>, vector<64x256xf32>
      %36 = arith.addf %35, %25 : vector<64x256xf32>
      %c0_20 = arith.constant 0 : index
      %c0_21 = arith.constant 0 : index
      %37 = vector.load %arg10[%c0_20, %c0_21] : memref<64x256xf32, #tpu.memory_space<vmem>>, vector<64x256xf32>
      tpu.vector_store %arg10[%c0_20, %c0_21], %36 {strides = array<i32>} : memref<64x256xf32, #tpu.memory_space<vmem>>, vector<64x256xf32>,
      %c0_22 = arith.constant 0 : index
      %c0_23 = arith.constant 0 : index
      %38 = vector.load %arg11[%c0_22, %c0_23] : memref<8x256xf32, #tpu.memory_space<vmem>>, vector<8x256xf32>
      %39 = arith.addf %38, %23 : vector<8x256xf32>
      %c0_24 = arith.constant 0 : index
      %c0_25 = arith.constant 0 : index
      %40 = vector.load %arg11[%c0_24, %c0_25] : memref<8x256xf32, #tpu.memory_space<vmem>>, vector<8x256xf32>
      tpu.vector_store %arg11[%c0_24, %c0_25], %39 {strides = array<i32>} : memref<8x256xf32, #tpu.memory_space<vmem>>, vector<8x256xf32>,
    } else {
    }
    %c1_i32 = arith.constant 1 : i32
    %32 = arith.cmpi eq, %arg1, %c1_i32 : i32
    %33 = arith.extui %32 : i1 to i32
    %c0_i32_17 = arith.constant 0 : i32
    %34 = arith.cmpi ne, %33, %c0_i32_17 : i32
    scf.if %34 {
      %c0_18 = arith.constant 0 : index
      %c0_19 = arith.constant 0 : index
      %35 = vector.load %arg10[%c0_18, %c0_19] : memref<64x256xf32, #tpu.memory_space<vmem>>, vector<64x256xf32>
      %c0_20 = arith.constant 0 : index
      %c0_21 = arith.constant 0 : index
      %36 = vector.load %arg6[%c0_20, %c0_21] : memref<1x256xbf16, #tpu.memory_space<vmem>>, vector<1x256xbf16>
      %37 = arith.extf %36 : vector<1x256xbf16> to vector<1x256xf32>
      %38 = vector.broadcast %37 : vector<1x256xf32> to vector<64x256xf32>
      %39 = arith.addf %35, %38 : vector<64x256xf32>
      %c0_22 = arith.constant 0 : index
      %c0_23 = arith.constant 0 : index
      %40 = vector.load %arg2[%c0_22, %c0_23] : memref<64x256xbf16, #tpu.memory_space<vmem>>, vector<64x256xbf16>
      %41 = arith.extf %40 : vector<64x256xbf16> to vector<64x256xf32>
      %42 = arith.subf %41, %39 : vector<64x256xf32>
      %43 = tpu.iota {dimensions = array<i32: 0>} : vector<64x1xi32>
      %c64_i32_24 = arith.constant 64 : i32
      %44 = arith.muli %arg0, %c64_i32_24 : i32
      %c100_i32_25 = arith.constant 100 : i32
      %45 = arith.subi %c100_i32_25, %44 : i32
      %c64_i32_26 = arith.constant 64 : i32
      %46 = arith.minsi %45, %c64_i32_26 : i32
      %47 = vector.broadcast %46 : i32 to vector<64x1xi32>
      %48 = arith.cmpi slt, %43, %47 : vector<64x1xi32>
      %cst_27 = arith.constant 0.000000e+00 : f32
      %49 = vector.shape_cast %48 : vector<64x1xi1> to vector<64x1xi1>
      %50 = vector.broadcast %49 : vector<64x1xi1> to vector<64x256xi1>
      %51 = vector.broadcast %cst_27 : f32 to vector<64x256xf32>
      %52 = arith.select %50, %42, %51 : vector<64x256xi1>, vector<64x256xf32>
      %53 = arith.mulf %52, %52 : vector<64x256xf32>
      %54 = vector.shape_cast %53 : vector<64x256xf32> to vector<1x64x256xf32>
      %cst_28 = arith.constant dense<0.000000e+00> : vector<1xf32>
      %55 = vector.multi_reduction <add>, %54, %cst_28 [1, 2] : vector<1x64x256xf32> to vector<1xf32>
      %56 = vector.shape_cast %55 : vector<1xf32> to vector<1x1x1xf32>
      %57 = vector.extract %56[0, 0, 0] : f32 from vector<1x1x1xf32>
      %58 = vector.broadcast %57 : f32 to vector<1x8x128xf32>
      %c0_29 = arith.constant 0 : index
      %c0_30 = arith.constant 0 : index
      %c0_31 = arith.constant 0 : index
      %59 = vector.load %arg8[%c0_29, %c0_30, %c0_31] : memref<1x8x128xf32, #tpu.memory_space<vmem>>, vector<1x8x128xf32>
      tpu.vector_store %arg8[%c0_29, %c0_30, %c0_31], %58 {strides = array<i32>} : memref<1x8x128xf32, #tpu.memory_space<vmem>>, vector<1x8x128xf32>,
      %c0_32 = arith.constant 0 : index
      %c0_33 = arith.constant 0 : index
      %60 = vector.load %arg11[%c0_32, %c0_33] : memref<8x256xf32, #tpu.memory_space<vmem>>, vector<8x256xf32>
      %61 = vector.shape_cast %60 : vector<8x256xf32> to vector<1x8x256xf32>
      %cst_34 = arith.constant dense<0.000000e+00> : vector<1xf32>
      %62 = vector.multi_reduction <add>, %61, %cst_34 [1, 2] : vector<1x8x256xf32> to vector<1xf32>
      %63 = vector.shape_cast %62 : vector<1xf32> to vector<1x1x1xf32>
      %64 = vector.extract %63[0, 0, 0] : f32 from vector<1x1x1xf32>
      %65 = vector.broadcast %64 : f32 to vector<1x8x128xf32>
      %c0_35 = arith.constant 0 : index
      %c0_36 = arith.constant 0 : index
      %c0_37 = arith.constant 0 : index
      %66 = vector.load %arg9[%c0_35, %c0_36, %c0_37] : memref<1x8x128xf32, #tpu.memory_space<vmem>>, vector<1x8x128xf32>
      tpu.vector_store %arg9[%c0_35, %c0_36, %c0_37], %65 {strides = array<i32>} : memref<1x8x128xf32, #tpu.memory_space<vmem>>, vector<1x8x128xf32>,
    } else {
    }
    return
  }
  func.func @transform_0(%arg0: i32, %arg1: i32) -> (i32, i32) {
    %c0_i32 = arith.constant 0 : i32
    %c0_i32_0 = arith.constant 0 : i32
    return %arg0, %c0_i32 : i32, i32
  }
  func.func @transform_1(%arg0: i32, %arg1: i32) -> (i32, i32) {
    %c0_i32 = arith.constant 0 : i32
    %c0_i32_0 = arith.constant 0 : i32
    return %c0_i32, %arg1 : i32, i32
  }
  func.func @transform_2(%arg0: i32, %arg1: i32) -> (i32, i32) {
    %c0_i32 = arith.constant 0 : i32
    %c0_i32_0 = arith.constant 0 : i32
    return %arg1, %c0_i32 : i32, i32
  }
  func.func @transform_3(%arg0: i32, %arg1: i32) -> (i32, i32) {
    %c0_i32 = arith.constant 0 : i32
    %c0_i32_0 = arith.constant 0 : i32
    return %c0_i32, %arg1 : i32, i32
  }
  func.func @transform_4(%arg0: i32, %arg1: i32) -> (i32, i32) {
    %c0_i32 = arith.constant 0 : i32
    %c0_i32_0 = arith.constant 0 : i32
    %c0_i32_1 = arith.constant 0 : i32
    return %c0_i32, %c0_i32_0 : i32, i32
  }
  func.func @transform_5(%arg0: i32, %arg1: i32) -> (i32, i32) {
    %c0_i32 = arith.constant 0 : i32
    return %arg0, %arg1 : i32, i32
  }
  func.func @transform_6(%arg0: i32, %arg1: i32) -> (i32, i32, i32) {
    %c0_i32 = arith.constant 0 : i32
    %c0_i32_0 = arith.constant 0 : i32
    %c0_i32_1 = arith.constant 0 : i32
    return %arg0, %c0_i32, %c0_i32_0 : i32, i32, i32
  }
  func.func @transform_7(%arg0: i32, %arg1: i32) -> (i32, i32, i32) {
    %c0_i32 = arith.constant 0 : i32
    %c0_i32_0 = arith.constant 0 : i32
    %c0_i32_1 = arith.constant 0 : i32
    return %arg0, %c0_i32, %c0_i32_0 : i32, i32, i32
  }
}

</mosaic_0001>

<bundles_post_ra>
// kernel: tpu_custom_call.1
= control target key start
LH: loop header
LB: loop body
LE: loop exit
PB: predicated region body
PF: predicated region fallthrough
CT: control target
= control target key end

     0   :  { %s3175_s0 = inlined_call_operand.hbm [shape: bf16[128,256], index: 0, kind: input, shape index: {}]   ;;  %s3176_s1 = inlined_call_operand.hbm [shape: bf16[256,512], index: 1, kind: input, shape index: {}]   ;;  %s3177_s2 = inlined_call_operand.hbm [shape: bf16[512,256], index: 2, kind: input, shape index: {}]   ;;  %s3178_s3 = inlined_call_operand.vmem [shape: bf16[1,512], index: 3, kind: input, shape index: {}]   ;;  %s3179_s4 = inlined_call_operand.vmem [shape: bf16[1,256], index: 4, kind: input, shape index: {}]   ;;  %s3180_s5 = inlined_call_operand.hbm [shape: bf16[128,512], index: 5, kind: output, shape index: {0}]   ;;  %s3181_s6 = inlined_call_operand.hbm [shape: f32[2,8,128], index: 6, kind: output, shape index: {1}]   ;;  %s3182_s7 = inlined_call_operand.hbm [shape: f32[2,8,128], index: 7, kind: output, shape index: {2}]  }
   0x1   :  { %3205 = sst [smem:[#allocation31_spill]] %s3175_s0 }
   0x2   :  { %3206 = sst [smem:[#allocation32_spill]] %s3176_s1 }
   0x3   :  { %3207 = sst [smem:[#allocation33_spill]] %s3178_s3 }
   0x4   :  { %3208 = sst [smem:[#allocation34_spill]] %s3179_s4 }
   0x5   :  { %3209 = sst [smem:[#allocation35_spill]] %s3180_s5 }
   0x6   :  { %3210 = sst [smem:[#allocation36_spill]] %s3181_s6 }
   0x7   :  { %3211 = sst [smem:[#allocation37_spill]] %s3182_s7 }
   0x8   :  { %13 = vsyncpa [#allocation5], 0 }
   0x9   :  { %15 = vsyncpa [#allocation5 + $0x1], 0 }
   0xa   :  { %16 = vsyncpa [#allocation8], 0 }
   0xb   :  { %18 = vsyncpa [#allocation8 + $0x1], 0 }
   0xc   :  { %19 = vsyncpa [#allocation6], 0 }
   0xd   :  { %21 = vsyncpa [#allocation6 + $0x1], 0 }
   0xe   :  { %22 = vsyncpa [#allocation12], 0 }
   0xf   :  { %24 = vsyncpa [#allocation12 + $0x1], 0  ;;  %s2427_s24 = smov 0   ;;  %s2429_s25 = smov 0  }
  0x10   :  { %s2431_s26 = smov 0   ;;  %s2433_s27 = smov 0  }
  0x11   :  { %s2435_s28 = smov 0   ;;  %s2437_s29 = smov 0  }
  0x12   :  { %s2439_s30 = smov 0   ;;  %s2441_s8 = smov 0  }
  0x13   :  { %s2443_s9 = smov 0   ;;  %s2445_s10 = smov 0  }
  0x14   :  { %s2447_s11 = smov 0   ;;  %s2449_s12 = smov 0  }
  0x15   :  { %s2451_s13 = smov 0   ;;  %s2453_s14 = smov 0  }
  0x16 LB: > { %3212 = sst [smem:[#allocation18_spill]] %s2329_s26  ;;  %s3184_s15 = sadd.s32 1, %s2365_s12  ;;  %s2373_s14 = sphi %s2453_s14, %s30_s14   ;;  %s2369_s13 = sphi %s2451_s13, %s3272_s13   ;;  %s2365_s12 = sphi %s2449_s12, %s3271_s12   ;;  %s2361_s11 = sphi %s2447_s11, %s3270_s11   ;;  %s2357_s10 = sphi %s2445_s10, %s3269_s10   ;;  %s2353_s9 = sphi %s2443_s9, %s3268_s9   ;;  %s2349_s8 = sphi %s2441_s8, %s3279_s8   ;;  %s2345_s30 = sphi %s2439_s30, %s3278_s30   ;;  %s2341_s29 = sphi %s2437_s29, %s3266_s29   ;;  %s2337_s28 = sphi %s2435_s28, %s3277_s28   ;;  %s2333_s27 = sphi %s2433_s27, %s3276_s27   ;;  %s2329_s26 = sphi %s2431_s26, %s3264_s26   ;;  %s2325_s25 = sphi %s2429_s25, %s3275_s25   ;;  %s2321_s24 = sphi %s2427_s24, %s3274_s24  }
  0x17   : > { %3213 = sst [smem:[#allocation19_spill]] %s2341_s29  ;;  %p57_p0 = scmp.eq.s32.totalorder %s2373_s14, 0 }
  0x18   : > { %3214 = sst [smem:[#allocation20_spill]] %s2353_s9  ;;  %p2501_p1 = scmp.ge.s32.totalorder %s3184_s15, 2 }
  0x19   : > { %3215 = sst [smem:[#allocation21_spill]] %s2357_s10  ;;  %p82_p2 = scmp.ne.s32.totalorder %s2341_s29, %s2337_s28 }
  0x1a   : > { %3216 = sst [smem:[#allocation22_spill]] %s2361_s11  ;;  %p88_p3 = scmp.ne.s32.totalorder %s2337_s28, %s2333_s27 }
  0x1b   : > { %3217 = sst [smem:[#allocation23_spill]] %s2365_s12  ;;  %p3195_p4 = scmp.lt.s32.totalorder %s2373_s14, 4 }
  0x1c   : > { %3218 = sst [smem:[#allocation24_spill]] %s2369_s13  ;;  %p84_p5 = por %p82_p2, %p57_p0 }
  0x1d   : > { %s290_s18 = sand.u32 1, %s2373_s14   ;;  %s292_s19 = sand.u32 1, %s2341_s29  }
  0x1e   : > { %s2515_s20 = sshll.u32 %s292_s19, 8  ;;  %s1809_s21 = sshll.u32 %s2365_s12, 7 }
  0x1f   : > { %s3220_s1 = sld [smem:[#allocation32_spill]]  ;;  %s294_s15 = scalar_lea.vmem [#allocation7], %s2515_s20 }
  0x20   : > { %s301_s5 = sshll.u32 %s294_s15, 4  ;;  %p2524_p6 = pnand %p3195_p4, %p84_p5  ;;  %s302_s5 = int_to_ptr.vmem [resolvable:$true] %s301_s5 }
  0x21   : > { %p1704_p7 = scmp.ge.s32.totalorder %s2373_s14, 1  ;;  %s2529_s6 = scalar_lea.sflag [#allocation8], %s290_s18 }
  0x22   : > { %p3194_p8 = pneg %p2524_p6  ;;  %s2098_s19 = scalar_lea.vmem %s302_s5, 4096 }
  0x23   : > { %p2099_p9 = scmp.ne.s32.totalorder %s302_s5, %s2098_s19  ;;  %s2375_s15 = smov [#allocation7]  }
  0x25   : > { %s300_s7 = scalar_lea.hbm %s3220_s1, %s1809_s21  ;;  %p2101_p10 = pnand %p2099_p9, %p3194_p8 }
  0x26   : > { %s2103_s21 = sshll.u32 %s2375_s15, 4  ;;  %s2104_s21 = int_to_ptr.vmem [resolvable:$false] %s2103_s21 }
  0x27   : > { %p2102_p11 = pneg %p2101_p10  ;;  %s2105_s22 = scalar_lea.vmem %s2104_s21, 8192 }
  0x28   : > { %p2106_p12 = scmp.lt.s32.totalorder %s302_s5, %s2104_s21  ;;  %p2107_p13 = scmp.lt.s32.totalorder %s2105_s22, %s2098_s19 }
  0x2a   : > { %p2108_p2 = por %p2107_p13, %p2106_p12 }
  0x2c   : > { %p2109_p5 = pnand %p2108_p2, %p2102_p11 }
  0x2e   : > { %2112 = shalt.err (!%p2109_p5)
}
  0x2f   : > { %s2376_s23 = smov 256   ;;  %s3187_s18 = smov 128  }
  0x30   : > { %s3189_s19 = smov 8   ;;  %p339_p9 = scmp.lt.s32.totalorder %s2373_s14, 5 }
  0x31   : > { %1843 = dma.hbm_to_vmem [thread:$0]  (!%p2524_p6), %s300_s7, 4096, %s302_s5, %s2529_s6, %s2376_s23, %s3187_s18, %s3189_s19  }
  0x32   : > { %p2544_p10 = pnand %p1704_p7, %p339_p9  ;;  %s2549_s21 = sadd.s32 4294967295, %s2373_s14  }
  0x33   : > { %s3223_s1 = sadd.s32 1, %s2365_s12  ;;  %s42_s5 = sadd.s32 1, %s2369_s13 }
  0x34   : > { %s3281_s1 = smov (%p2501_p1, %s3223_s1), 0  ;;  %s49_s7 = sadd.s32 1, %s2353_s9 }
  0x35   : > { %3224 = sst [smem:[#allocation25_spill]] %s3281_s1  ;;  %s3283_s5 = smov (!%p2501_p1, %s42_s5), %s2369_s13 }
  0x36   : > { %p56_p7 = scmp.ne.s32.totalorder %s2353_s9, %s2349_s8  ;;  %p3197_p11 = scmp.ne.s32.totalorder %s2349_s8, %s2345_s30 }
  0x37   : > { %p44_p12 = scmp.ge.s32.totalorder %s3283_s5, 2  ;;  %p63_p13 = scmp.eq.s32.totalorder %s2549_s21, 0 }
  0x38   : > { %p2573_p2 = por %p57_p0, %p56_p7  ;;  %s72_s18 = ssub.s32 %s2365_s12, %s3281_s1 }
  0x39   : > { %s3285_s5 = smov (%p44_p12, %s3283_s5), 0  ;;  %p2584_p1 = por %p63_p13, %p3197_p11 }
  0x3a   : > { %3226 = sst [smem:[#allocation26_spill]] %s3285_s5  ;;  %p73_p5 = scmp.eq.s32.totalorder %s72_s18, 0 }
  0x3b   : > { %s46_s19 = ssub.s32 %s2369_s13, %s3285_s5  ;;  %p2593_p0 = por %p88_p3, %p63_p13 }
  0x3c   : > { %p47_p9 = scmp.eq.s32.totalorder %s46_s19, 0  ;;  %s173_s1 = sor.u32 %s72_s18, %s46_s19 }
  0x3d   : > { %s3228_s22 = scalar_select %p2593_p0, 1, 0 }
  0x3e   : > { %s3229_s4 = sadd.s32 1, %s2341_s29  ;;  %p174_p12 = scmp.eq.s32.totalorder %s173_s1, 0 }
  0x3f   : > { %s2600_s3 = scalar_select %p73_p5, %s2341_s29, %s3229_s4  }
  0x40   : > { %s2603_s11 = scalar_select %p47_p9, %s2353_s9, %s49_s7  }
  0x41   : > { %3230 = sst [smem:[#allocation27_spill]] %s2600_s3  ;;  %s176_s10 = sadd.s32 1, %s2329_s26 }
  0x42   : > { %3231 = sst [smem:[#allocation28_spill]] %s2603_s11  ;;  %p186_p8 = scmp.ne.s32.totalorder %s2329_s26, %s2325_s25 }
  0x43   : > { %p187_p4 = scmp.eq.s32.totalorder %s2549_s21, 3  ;;  %p192_p13 = scmp.ne.s32.totalorder %s2325_s25, %s2321_s24 }
  0x44   : > { %s2610_s27 = scalar_select %p174_p12, %s2329_s26, %s176_s10  }
  0x45   : > { %p2612_p3 = por %p187_p4, %p186_p8  ;;  %s3234_s18 = sadd.s32 4294967294, %s2373_s14  }
  0x46   : > { %3232 = sst [smem:[#allocation29_spill]] %s2610_s27  ;;  %p193_p11 = scmp.eq.s32.totalorder %s3234_s18, 3 }
  0x47   : > { %p2623_p5 = por %p187_p4, %p56_p7  ;;  %s268_s1 = sand.u32 1, %s2353_s9  }
  0x48   : > { %s1808_s19 = sshll.u32 %s2369_s13, 10  ;;  %p2629_p9 = por %p193_p11, %p192_p13 }
  0x49   : > { %p3237_p12 = scmp.ne.s32.totalorder %s2349_s8, %s2345_s30  ;;  %s1693_s11 = sshll.u32 %s268_s1, 6 }
  0x4a   : > { %s3236_s7 = scalar_select %p2629_p9, 1, 0 }
  0x4b   : > { %p2636_p0 = por %p193_p11, %p3237_p12  ;;  %s3240_s0 = sld [smem:[#allocation31_spill]] }
  0x4c   : > { %s272_s27 = scalar_lea.vmem [#allocation4], %s1693_s11  ;;  %p3241_p4 = scmp.lt.s32.totalorder %s2373_s14, 4 }
  0x4d   : > { %s3238_s10 = scalar_select %p2636_p0, 1, 0 }
  0x4e   : > { %s280_s26 = sshll.u32 %s272_s27, 4  ;;  %p2647_p8 = pnand %p3241_p4, %p2573_p2  ;;  %s281_s26 = int_to_ptr.vmem [resolvable:$true] %s280_s26 }
  0x4f   : > { %3239 = sst [smem:[#allocation30_spill]] %s3238_s10  ;;  %s1811_s30 = sshll.u32 %s2365_s12, 12 }
  0x50   : > { %s269_s9 = scalar_lea.sflag [#allocation5], %s268_s1  ;;  %p2115_p7 = pneg %p2647_p8 }
  0x51   : > { %s279_s18 = scalar_lea.hbm %s3240_s0, %s1808_s19  ;;  %s2126_s10 = scalar_lea.vmem %s281_s26, 1024 }
  0x52   : > { %p2127_p11 = scmp.ne.s32.totalorder %s281_s26, %s2126_s10  ;;  %s2379_s3 = smov [#allocation4]  }
  0x53   : > { %s2131_s29 = sshll.u32 %s2379_s3, 4  ;;  %s2132_s29 = int_to_ptr.vmem [resolvable:$false] %s2131_s29 }
  0x54   : > { %p2129_p13 = pnand %p2127_p11, %p2115_p7  ;;  %s2133_s11 = scalar_lea.vmem %s2132_s29, 2048 }
  0x55   : > { %p2134_p0 = scmp.lt.s32.totalorder %s281_s26, %s2132_s29  ;;  %p2135_p9 = scmp.lt.s32.totalorder %s2133_s11, %s2126_s10 }
  0x56   : > { %p2130_p12 = pneg %p2129_p13 }
  0x57   : > { %p2136_p2 = por %p2135_p9, %p2134_p0 }
  0x59   : > { %p2137_p4 = pnand %p2136_p2, %p2130_p12 }
  0x5b   : > { %2140 = shalt.err (!%p2137_p4)
}
  0x5c   : > { %s3243_s23 = smov 8   ;;  %s3244_s27 = smov 128  }
  0x5d   : > { %1840 = dma.hbm_to_vmem [thread:$0]  (!%p2647_p8), %s279_s18, 1024, %s281_s26, %s269_s9, %s3244_s27, %s3244_s27, %s3243_s23  }
  0x5e   : > { %s322_s0 = scalar_lea.hbm %s3177_s2, %s1811_s30  ;;  %s315_s3 = scalar_lea.vmem [#allocation9], %s2515_s20 }
  0x5f   : > { %s323_s12 = sshll.u32 %s315_s3, 4  ;;  %p3245_p0 = pneg %p2524_p6  ;;  %s324_s12 = int_to_ptr.vmem [resolvable:$true] %s323_s12 }
  0x60   : > { %s2154_s29 = scalar_lea.vmem %s324_s12, 4096  ;;  %s2380_s13 = smov [#allocation9]  }
  0x61   : > { %p2155_p7 = scmp.ne.s32.totalorder %s324_s12, %s2154_s29  ;;  %s2159_s10 = sshll.u32 %s2380_s13, 4  ;;  %s2160_s10 = int_to_ptr.vmem [resolvable:$false] %s2159_s10 }
  0x62   : > { %s2161_s11 = scalar_lea.vmem %s2160_s10, 8192  ;;  %p2162_p13 = scmp.lt.s32.totalorder %s324_s12, %s2160_s10 }
  0x63   : > { %p2157_p9 = pnand %p2155_p7, %p3245_p0  ;;  %p2163_p12 = scmp.lt.s32.totalorder %s2161_s11, %s2154_s29 }
  0x65   : > { %p2158_p11 = pneg %p2157_p9  ;;  %p2164_p8 = por %p2163_p12, %p2162_p13 }
  0x67   : > { %p2165_p2 = pnand %p2164_p8, %p2158_p11 }
  0x69   : > { %2168 = shalt.err (!%p2165_p2)
}
  0x6a   : > { %1846 = dma.hbm_to_vmem [thread:$0]  (!%p2524_p6), %s322_s0, 4096, %s324_s12, %s2529_s6, %s3244_s27, %s3244_s27, %s3243_s23  }
  0x6b   : > { %343 = sbr.rel (%p2544_p10) target bundleno = 984 (0x3d8), region = 40  ;;  %s2675_s26 = sand.u32 (!%p2544_p10), 1, %s2349_s8  }
  0x6c   : > { %s1705_s9 = sshll.u32 (!%p2544_p10), %s2675_s26, 6  ;;  %s346_s20 = scalar_lea.sflag (!%p2544_p10), [#allocation5], %s2675_s26 }
  0x6d   : > { %s2679_s18 = scalar_lea.vmem (!%p2544_p10), [#allocation4], %s1705_s9 }
  0x70   : > { %2304 = dma.done.wait (%p2584_p1), %s346_s20, 1024  }
  0x71   : > { %2306 = vsyncadd (%p2584_p1), %s346_s20, 4294966272  ;;  %s354_s0 = sand.u32 1, %s2549_s21   ;;  %s356_s6 = sand.u32 1, %s2337_s28  }
  0x72   : > { %s2687_s12 = sshll.u32 %s356_s6, 8  ;;  %s355_s17 = scalar_lea.sflag [#allocation8], %s354_s0 }
  0x73   : > { %s2692_s15 = scalar_lea.vmem [#allocation7], %s2687_s12  ;;  %p3246_p6 = scmp.ne.s32.totalorder %s3228_s22, 0 }
  0x75   : > { %2308 = dma.done.wait (%p3246_p6), %s355_s17, 8192  }
  0x76   : > { %2310 = vsyncadd (%p3246_p6), %s355_s17, 4294959104  ;;  %s1709_s16 = sshll.u32 %s2675_s26, 3  ;;  %v1977_v0 = vld [vmem:[%s2692_s15 + $0x74] ss:$8 sps:$4 sm:$0xff]   ;;  %v1979_v1 = vld [vmem:[%s2692_s15 + $0x70] ss:$8 sps:$4 sm:$0xff]  }
  0x77   : > { %693 = vmatprep.subr.bf16.mxu0 %v1977_v0  ;;  %v1980_v2 = vld [vmem:[%s2692_s15 + $0x64] ss:$8 sps:$4 sm:$0xff]   ;;  %v1982_v3 = vld [vmem:[%s2692_s15 + $0x60] ss:$8 sps:$4 sm:$0xff]   ;;  %v1983_v4 = vld [vmem:[%s2692_s15 + $0x54] ss:$8 sps:$4 sm:$0xff]  }
  0x78   : > { %694 = vmatpush1.bf16.msra.mxu0 %v1979_v1  ;;  %v1985_v5 = vld [vmem:[%s2692_s15 + $0x50] ss:$8 sps:$4 sm:$0xff]   ;;  %v1986_v6 = vld [vmem:[%s2692_s15 + $0x44] ss:$8 sps:$4 sm:$0xff]   ;;  %v1988_v7 = vld [vmem:[%s2692_s15 + $0x40] ss:$8 sps:$4 sm:$0xff]  }
  0x79   : > { %695 = vmatprep.subr.bf16.mxu0 %v1980_v2  ;;  %v1989_v8 = vld [vmem:[%s2692_s15 + $0x34] ss:$8 sps:$4 sm:$0xff]   ;;  %v1991_v9 = vld [vmem:[%s2692_s15 + $0x30] ss:$8 sps:$4 sm:$0xff]   ;;  %v1992_v10 = vld [vmem:[%s2692_s15 + $0x24] ss:$8 sps:$4 sm:$0xff]  }
  0x7a   : > { %v1994_v11 = vld [vmem:[%s2692_s15 + $0x20] ss:$8 sps:$4 sm:$0xff]   ;;  %v1995_v12 = vld [vmem:[%s2692_s15 + $0x14] ss:$8 sps:$4 sm:$0xff]   ;;  %v2027_v13 = vld [vmem:[%s2679_s18 + $0x4] ss:$8 sps:$4 sm:$0xff]  }
  0x7b   : > { %v1997_v14 = vld [vmem:[%s2692_s15 + $0x10] ss:$8 sps:$4 sm:$0xff]   ;;  %v1998_v15 = vld [vmem:[%s2692_s15 + $0x4] ss:$8 sps:$4 sm:$0xff]   ;;  %725 = vmatprep.mubr.bf16.mxu0 %v2027_v13  ;;  %v2000_v16 = vld [vmem:[%s2692_s15] ss:$8 sps:$4 sm:$0xff]  }
  0x7c   : > { %696 = vmatpush1.bf16.msra.mxu0 %v1982_v3  ;;  %v2001_v17 = vld [vmem:[%s2692_s15 + $0xf4] ss:$8 sps:$4 sm:$0xff]   ;;  %s2718_s22 = scalar_lea.vmem [#allocation9], %s2687_s12  ;;  %v2003_v22 = vld [vmem:[%s2692_s15 + $0xf0] ss:$8 sps:$4 sm:$0xff]   ;;  %s3247_s30 = sld [smem:[#allocation21_spill]] }
  0x7d   : > { %697 = vmatprep.subr.bf16.mxu0 %v1983_v4  ;;  %v2037_v18 = vld [vmem:[%s2718_s22 + $0x74] ss:$8 sps:$4 sm:$0xff]   ;;  %v2039_v19 = vld [vmem:[%s2718_s22 + $0x70] ss:$8 sps:$4 sm:$0xff]   ;;  %v2040_v20 = vld [vmem:[%s2718_s22 + $0x64] ss:$8 sps:$4 sm:$0xff]  }
  0x7e   : > { %1114 = vmatprep.subr.bf16.mxu1 %v2037_v18  ;;  %v2042_v21 = vld [vmem:[%s2718_s22 + $0x60] ss:$8 sps:$4 sm:$0xff]   ;;  %v2043_v23 = vld [vmem:[%s2718_s22 + $0x54] ss:$8 sps:$4 sm:$0xff]   ;;  %v2004_v24 = vld [vmem:[%s2692_s15 + $0xe4] ss:$8 sps:$4 sm:$0xff]  }
  0x7f   : > { %1115 = vmatpush1.bf16.msra.mxu1 %v2039_v19  ;;  %v2045_v25 = vld [vmem:[%s2718_s22 + $0x50] ss:$8 sps:$4 sm:$0xff]   ;;  %v2006_v26 = vld [vmem:[%s2692_s15 + $0xe0] ss:$8 sps:$4 sm:$0xff]   ;;  %v2046_v27 = vld [vmem:[%s2718_s22 + $0x44] ss:$8 sps:$4 sm:$0xff]  }
  0x80   : > { %698 = vmatpush1.bf16.msra.mxu0 %v1985_v5  ;;  %1116 = vmatprep.subr.bf16.mxu1 %v2040_v20  ;;  %v2007_v28 = vld [vmem:[%s2692_s15 + $0xd4] ss:$8 sps:$4 sm:$0xff]   ;;  %v2048_v29 = vld [vmem:[%s2718_s22 + $0x40] ss:$8 sps:$4 sm:$0xff]   ;;  %v2009_v30 = vld [vmem:[%s2692_s15 + $0xd0] ss:$8 sps:$4 sm:$0xff]  }
  0x81   : > { %699 = vmatprep.subr.bf16.mxu0 %v1986_v6  ;;  %v2049_v31 = vld [vmem:[%s2718_s22 + $0x34] ss:$8 sps:$4 sm:$0xff]   ;;  %v2010_v32 = vld [vmem:[%s2692_s15 + $0xc4] ss:$8 sps:$4 sm:$0xff]   ;;  %v2051_v33 = vld [vmem:[%s2718_s22 + $0x30] ss:$8 sps:$4 sm:$0xff]  }
  0x82   : > { %v2012_v34 = vld [vmem:[%s2692_s15 + $0xc0] ss:$8 sps:$4 sm:$0xff]   ;;  %v2052_v35 = vld [vmem:[%s2718_s22 + $0x24] ss:$8 sps:$4 sm:$0xff]   ;;  %v2013_v36 = vld [vmem:[%s2692_s15 + $0xb4] ss:$8 sps:$4 sm:$0xff]  }
  0x83   : > { %1117 = vmatpush1.bf16.msra.mxu1 %v2042_v21  ;;  %v2054_v37 = vld [vmem:[%s2718_s22 + $0x20] ss:$8 sps:$4 sm:$0xff]   ;;  %v2015_v38 = vld [vmem:[%s2692_s15 + $0xb0] ss:$8 sps:$4 sm:$0xff]   ;;  %v2055_v39 = vld [vmem:[%s2718_s22 + $0x14] ss:$8 sps:$4 sm:$0xff]  }
  0x84   : > { %700 = vmatpush1.bf16.msra.mxu0 %v1988_v7  ;;  %1118 = vmatprep.subr.bf16.mxu1 %v2043_v23  ;;  %v2016_v40 = vld [vmem:[%s2692_s15 + $0xa4] ss:$8 sps:$4 sm:$0xff]   ;;  %v2057_v41 = vld [vmem:[%s2718_s22 + $0x10] ss:$8 sps:$4 sm:$0xff]   ;;  %v2018_v42 = vld [vmem:[%s2692_s15 + $0xa0] ss:$8 sps:$4 sm:$0xff]  }
  0x85   : > { %701 = vmatprep.subr.bf16.mxu0 %v1989_v8  ;;  %v2058_v43 = vld [vmem:[%s2718_s22 + $0x4] ss:$8 sps:$4 sm:$0xff]   ;;  %v2019_v44 = vld [vmem:[%s2692_s15 + $0x94] ss:$8 sps:$4 sm:$0xff]   ;;  %v2060_v45 = vld [vmem:[%s2718_s22] ss:$8 sps:$4 sm:$0xff]   ;;  %v475_v8 = vlaneseq }
  0x86   : > { %v2021_v46 = vld [vmem:[%s2692_s15 + $0x90] ss:$8 sps:$4 sm:$0xff]   ;;  %v2061_v47 = vld [vmem:[%s2718_s22 + $0xf4] ss:$8 sps:$4 sm:$0xff]   ;;  %v2022_v48 = vld [vmem:[%s2692_s15 + $0x84] ss:$8 sps:$4 sm:$0xff]  }
  0x87   : > { %1119 = vmatpush1.bf16.msra.mxu1 %v2045_v25  ;;  %v2063_v49 = vld [vmem:[%s2718_s22 + $0xf0] ss:$8 sps:$4 sm:$0xff]   ;;  %v2024_v50 = vld [vmem:[%s2692_s15 + $0x80] ss:$8 sps:$4 sm:$0xff]   ;;  %v2064_v51 = vld [vmem:[%s2718_s22 + $0xe4] ss:$8 sps:$4 sm:$0xff]  }
  0x88   : > { %702 = vmatpush1.bf16.msra.mxu0 %v1991_v9  ;;  %1120 = vmatprep.subr.bf16.mxu1 %v2046_v27  ;;  %v2025_v52 = vld [vmem:[%s2679_s18] ss:$8 sps:$4 sm:$0xff]   ;;  %v2028_v54 = vld [vmem:[%s2679_s18 + $0x14] ss:$8 sps:$4 sm:$0xff]   ;;  %v2069_v56 = vld [vmem:[%s2718_s22 + $0xd0] ss:$8 sps:$4 sm:$0xff]  }
  0x89   : > { %703 = vmatprep.subr.bf16.mxu0 %v1992_v10  ;;  %v2066_v53 = vld [vmem:[%s2718_s22 + $0xe0] ss:$8 sps:$4 sm:$0xff]   ;;  %v2067_v55 = vld [vmem:[%s2718_s22 + $0xd4] ss:$8 sps:$4 sm:$0xff]   ;;  %v2070_v57 = vld [vmem:[%s2718_s22 + $0xc4] ss:$8 sps:$4 sm:$0xff]  }
  0x8a   : > { %v2030_v58 = vld [vmem:[%s2679_s18 + $0x10] ss:$8 sps:$4 sm:$0xff]   ;;  %v2072_v59 = vld [vmem:[%s2718_s22 + $0xc0] ss:$8 sps:$4 sm:$0xff]   ;;  %v2031_v60 = vld [vmem:[%s2679_s18 + $0x24] ss:$8 sps:$4 sm:$0xff]  }
  0x8b   : > { %1121 = vmatpush1.bf16.msra.mxu1 %v2048_v29  ;;  %v2073_v61 = vld [vmem:[%s2718_s22 + $0xb4] ss:$8 sps:$4 sm:$0xff]   ;;  %v2075_v62 = vld [vmem:[%s2718_s22 + $0xb0] ss:$8 sps:$4 sm:$0xff]   ;;  %v2033_v63 = vld [vmem:[%s2679_s18 + $0x20] ss:$8 sps:$4 sm:$0xff]  }
  0x8c   : > { %704 = vmatpush1.bf16.msra.mxu0 %v1994_v11  ;;  %1122 = vmatprep.subr.bf16.mxu1 %v2049_v31  ;;  %v2034_v0 = vld [vmem:[%s2679_s18 + $0x34] ss:$8 sps:$4 sm:$0xff]   ;;  %v2036_v1 = vld [vmem:[%s2679_s18 + $0x30] ss:$8 sps:$4 sm:$0xff]   ;;  %v2076_v2 = vld [vmem:[%s2718_s22 + $0xa4] ss:$8 sps:$4 sm:$0xff]  }
  0x8d   : > { %705 = vmatprep.subr.bf16.mxu0 %v1995_v12  ;;  %v2078_v3 = vld [vmem:[%s2718_s22 + $0xa0] ss:$8 sps:$4 sm:$0xff]   ;;  %v2079_v4 = vld [vmem:[%s2718_s22 + $0x94] ss:$8 sps:$4 sm:$0xff]   ;;  %v2081_v5 = vld [vmem:[%s2718_s22 + $0x90] ss:$8 sps:$4 sm:$0xff]  }
  0x8e   : > { %v2082_v6 = vld [vmem:[%s2718_s22 + $0x84] ss:$8 sps:$4 sm:$0xff]   ;;  %s3248_s23 = sld [smem:[#allocation22_spill]]  ;;  %v2084_v7 = vld [vmem:[%s2718_s22 + $0x80] ss:$8 sps:$4 sm:$0xff]   ;;  %s2775_s27 = sshll.u32 %s3247_s30, 1 }
  0x8f   : > { %1123 = vmatpush1.bf16.msra.mxu1 %v2051_v33  ;;  %p426_p10 = scmp.lt.s32.totalorder %s2775_s27, 3  ;;  %s3249_s29 = sld [smem:[#allocation33_spill]]  ;;  %v2782_v9 = vshrl.u32 %v475_v8, 7 }
  0x90   : > { %706 = vmatpush1.bf16.msra.mxu0 %v1997_v14  ;;  %1124 = vmatprep.subr.bf16.mxu1 %v2052_v35  ;;  %s405_s9 = sand.u32 1, %s2325_s25   ;;  %s2928_s12 = scalar_lea.vmem [#allocation11], %s1709_s16 }
  0x91   : > { %707 = vmatprep.subr.bf16.mxu0 %v1998_v15  ;;  %s427_s1 = scalar_select %p426_p10, %s2775_s27, 3  ;;  %v2785_v12 = vsub.s32 0, %v2782_v9  ;;  %v481_v13 = vsub.s32 2, %v2782_v9 }
  0x92   : > { %s1708_s20 = sshll.u32 %s405_s9, 6  ;;  %s2932_s17 = scalar_lea.vmem [#allocation13], %s1709_s16 }
  0x93   : > { %1125 = vmatpush1.bf16.msra.mxu1 %v2054_v37  ;;  %s2808_s6 = scalar_lea.vmem [#allocation10], %s1708_s20  ;;  %p1793_p4 = scmp.ne.s32.totalorder %s3247_s30, 0 }
  0x94   : > { %708 = vmatpush1.bf16.msra.mxu0 %v2000_v16  ;;  %1126 = vmatprep.subr.bf16.mxu1 %v2055_v39  ;;  %s1760_s10 = sshll.u32 %s3248_s23, 6 }
  0x95   : > { %709 = vmatprep.subr.bf16.mxu0 %v2001_v17  ;;  %s428_s13 = scalar_lea.vmem %s3249_s29, %s427_s1  ;;  %s864_s11 = ssub.s32 100, %s1760_s10 }
  0x96   : > { %v472_v10 = vld [vmem:[%s428_s13] sm:$0x3]  ;;  %p865_p1 = scmp.lt.s32.totalorder %s864_s11, 64 }
  0x97   : > { %1127 = vmatpush1.bf16.msra.mxu1 %v2057_v41  ;;  %v473_v11 = vunpack.c.l.bf16 %v472_v10 }
  0x98   : > { %710 = vmatpush2.bf16.msra.mxu0 %v2003_v22  ;;  %1128 = vmatprep.subr.bf16.mxu1 %v2058_v43  ;;  %s3287_s11 = smov (!%p865_p1, %s864_s11), 64  ;;  %v2821_v43 = vadd.s32 16, %v2782_v9 }
  0x99   : > { %711 = vmatprep.subr.bf16.mxu0 %v2004_v24  ;;  %v478_v14 = vrot.slane %v473_v11, %v2785_v12  ;;  %v482_v15 = vrot.slane %v473_v11, %v481_v13  ;;  %v2811_v33 = vstv %s3287_s11 }
  0x9a   : > { %vm868_vm0 = vcmp.lt.s32.totalorder %v2782_v9, %v2811_v33  ;;  %vm870_vm2 = vcmp.lt.s32.totalorder %v2821_v43, %v2811_v33 }
  0x9b   : > { %1129 = vmatpush1.bf16.msra.mxu1 %v2060_v45  ;;  %v2793_v16 = vrot.slane %v478_v14, %v2785_v12  ;;  %v2796_v17 = vrot.slane %v482_v15, %v2785_v12 }
  0x9c   : > { %712 = vmatpush2.bf16.msra.mxu0 %v2006_v26  ;;  %1130 = vmatprep.subr.bf16.mxu1 %v2061_v47 }
  0x9d   : > { %713 = vmatprep.subr.bf16.mxu0 %v2007_v28 }
  0x9f   : > { %1131 = vmatpush2.bf16.msra.mxu1 %v2063_v49 }
  0xa0   : > { %714 = vmatpush2.bf16.msra.mxu0 %v2009_v30  ;;  %1132 = vmatprep.subr.bf16.mxu1 %v2064_v51  ;;  %v2806_v30 = vadd.s32 8, %v2782_v9 }
  0xa1   : > { %715 = vmatprep.subr.bf16.mxu0 %v2010_v32 }
  0xa2   : > { %vm869_vm1 = vcmp.lt.s32.totalorder %v2806_v30, %v2811_v33 }
  0xa3   : > { %1133 = vmatpush2.bf16.msra.mxu1 %v2066_v53 }
  0xa4   : > { %716 = vmatpush2.bf16.msra.mxu0 %v2012_v34  ;;  %1134 = vmatprep.subr.bf16.mxu1 %v2067_v55 }
  0xa5   : > { %717 = vmatprep.subr.bf16.mxu0 %v2013_v36 }
  0xa7   : > { %1135 = vmatpush2.bf16.msra.mxu1 %v2069_v56 }
  0xa8   : > { %718 = vmatpush2.bf16.msra.mxu0 %v2015_v38  ;;  %1136 = vmatprep.subr.bf16.mxu1 %v2070_v57 }
  0xa9   : > { %719 = vmatprep.subr.bf16.mxu0 %v2016_v40 }
  0xab   : > { %1137 = vmatpush2.bf16.msra.mxu1 %v2072_v59 }
  0xac   : > { %720 = vmatpush2.bf16.msra.mxu0 %v2018_v42  ;;  %1138 = vmatprep.subr.bf16.mxu1 %v2073_v61 }
  0xad   : > { %721 = vmatprep.subr.bf16.mxu0 %v2019_v44  ;;  %v2824_v44 = vadd.s32 24, %v2782_v9 }
  0xaf   : > { %1139 = vmatpush2.bf16.msra.mxu1 %v2075_v62  ;;  %vm871_vm3 = vcmp.lt.s32.totalorder %v2824_v44, %v2811_v33 }
  0xb0   : > { %722 = vmatpush2.bf16.msra.mxu0 %v2021_v46  ;;  %1140 = vmatprep.subr.bf16.mxu1 %v2076_v2 }
  0xb1   : > { %723 = vmatprep.subr.bf16.mxu0 %v2022_v48 }
  0xb3   : > { %1141 = vmatpush2.bf16.msra.mxu1 %v2078_v3 }
  0xb4   : > { %724 = vmatpush2.bf16.msra.mxu0 %v2024_v50  ;;  %1142 = vmatprep.subr.bf16.mxu1 %v2079_v4 }
  0xb7   : > { %726 = vmatmul.mubr.bf16.vlgmr.msra.gmra.mxu0 %v2025_v52  ;;  %1143 = vmatpush2.bf16.msra.mxu1 %v2081_v5 }
  0xb8   : > { %735 = vmatprep.mubr.bf16.mxu0 %v2028_v54  ;;  %1144 = vmatprep.subr.bf16.mxu1 %v2082_v6 }
  0xbb   : > { %1145 = vmatpush2.bf16.msra.mxu1 %v2084_v7 }
  0xbf   : > { %736 = vmatmul.mubr.bf16.gmra.mxu0 %v2030_v58 }
  0xc0   : > { %745 = vmatprep.mubr.bf16.mxu0 %v2031_v60 }
  0xc7   : > { %746 = vmatmul.mubr.bf16.gmra.mxu0 %v2033_v63 }
  0xc8   : > { %755 = vmatprep.mubr.bf16.mxu0 %v2034_v0 }
  0xcf   : > { %756 = vmatmul.mubr.bf16.gmra.mxu0 %v2036_v1 }
 0x177   : > { %v727_v18 = vpop.f32.mrf.mxu0 }
 0x178   : > { %v728_v19 = vadd.f32 %v727_v18, %v2793_v16 }
 0x179   : > { %v729_v20 = vpop.f32.mrf.mxu0 }
 0x17a   : > { %v730_v21 = vadd.f32 %v729_v20, %v2796_v17  ;;  %v766_v23 = vmax.f32 %v728_v19, 0.0 }
 0x17b   : > { %v731_v22 = vpop.f32.mrf.mxu0 }
 0x17c   : > { %v767_v24 = vmax.f32 %v730_v21, 0.0  ;;  %v732_v25 = vadd.f32 %v731_v22, %v2793_v16  ;;  %v2856_v22 = vadd.s32 32, %v2782_v9 }
 0x17d   : > { %v733_v26 = vpop.f32.mrf.mxu0 }
 0x17e   : > { %v1812_v27 = vpack.c.bf16 %v767_v24, %v766_v23  ;;  %v768_v28 = vmax.f32 %v732_v25, 0.0  ;;  %v734_v29 = vadd.f32 %v733_v26, %v2796_v17  ;;  %vm872_vm4 = vcmp.lt.s32.totalorder %v2856_v22, %v2811_v33 }
 0x17f   : > { %v737_v31 = vpop.f32.mrf.mxu0 }
 0x180   : > { %830 = vst [vmem:[%s2808_s6] sm:$0xff] %v1812_v27  ;;  %v782_v32 = vpack.c.bf16 %v768_v28, %v766_v23  ;;  %v769_v34 = vmax.f32 %v734_v29, 0.0  ;;  %v738_v35 = vadd.f32 %v737_v31, %v2793_v16  ;;  %v2867_v31 = vadd.s32 40, %v2782_v9 }
 0x181   : > { %v739_v36 = vpop.f32.mrf.mxu0 }
 0x182   : > { %v783_v37 = vpack.c.bf16 %v769_v34, %v767_v24  ;;  %v1813_v38 = vpack.c.bf16 %v769_v34, %v768_v28  ;;  %v740_v39 = vadd.f32 %v739_v36, %v2796_v17  ;;  %v838_v41 = vunpack.c.l.bf16 %v782_v32 }
 0x183   : > { %v741_v40 = vpop.f32.mrf.mxu0  ;;  %v840_v42 = vunpack.c.h.bf16 %v782_v32  ;;  %v770_v46 = vmax.f32 %v738_v35, 0.0  ;;  %vm873_vm5 = vcmp.lt.s32.totalorder %v2867_v31, %v2811_v33 }
 0x184   : > { %831 = vst [vmem:[%s2808_s6 + $0x8] sm:$0xff] %v1813_v38  ;;  %1146 = vmatprep.mubr.bf16.mxu1 %v783_v37  ;;  %v839_v45 = vunpack.c.l.bf16 %v783_v37  ;;  %v771_v47 = vmax.f32 %v740_v39, 0.0  ;;  %v742_v48 = vadd.f32 %v741_v40, %v2793_v16  ;;  %v841_v50 = vunpack.c.h.bf16 %v783_v37 }
 0x185   : > { %v743_v49 = vpop.f32.mrf.mxu0  ;;  %1147 = vmatmul.mubr.bf16.vlgmr.msra.gmra.mxu1 %v782_v32  ;;  %v892_v55 = vsel %vm868_vm0, %v838_v41, 0.0  ;;  %v894_v56 = vsel %vm869_vm1, %v840_v42, 0.0 }
 0x186   : > { %v744_v51 = vadd.f32 %v743_v49, %v2796_v17  ;;  %v1814_v52 = vpack.c.bf16 %v771_v47, %v770_v46  ;;  %v772_v53 = vmax.f32 %v742_v48, 0.0  ;;  %v893_v59 = vsel %vm868_vm0, %v839_v45, 0.0 }
 0x187   : > { %v747_v54 = vpop.f32.mrf.mxu0  ;;  %v895_v62 = vsel %vm869_vm1, %v841_v50, 0.0  ;;  %v908_v2 = vadd.f32 %v894_v56, %v892_v55 }
 0x188   : > { %v773_v57 = vmax.f32 %v744_v51, 0.0  ;;  %v748_v58 = vadd.f32 %v747_v54, %v2793_v16  ;;  %832 = vst [vmem:[%s2808_s6 + $0x10] sm:$0xff] %v1814_v52  ;;  %v784_v60 = vpack.c.bf16 %v772_v53, %v770_v46  ;;  %v915_v14 = vadd.f32 %v895_v62, %v893_v59 }
 0x189   : > { %v749_v61 = vpop.f32.mrf.mxu0  ;;  %v2881_v52 = vadd.s32 48, %v2782_v9  ;;  %v2891_v59 = vadd.s32 56, %v2782_v9 }
 0x18a   : > { %v785_v63 = vpack.c.bf16 %v773_v57, %v771_v47  ;;  %v1815_v0 = vpack.c.bf16 %v773_v57, %v772_v53  ;;  %v750_v1 = vadd.f32 %v749_v61, %v2796_v17  ;;  %v842_v3 = vunpack.c.l.bf16 %v784_v60 }
 0x18b   : > { %v844_v4 = vunpack.c.h.bf16 %v784_v60  ;;  %v774_v5 = vmax.f32 %v748_v58, 0.0  ;;  %v751_v6 = vpop.f32.mrf.mxu0  ;;  %vm874_vm6 = vcmp.lt.s32.totalorder %v2881_v52, %v2811_v33  ;;  %vm875_vm7 = vcmp.lt.s32.totalorder %v2891_v59, %v2811_v33 }
 0x18c   : > { %833 = vst [vmem:[%s2808_s6 + $0x18] sm:$0xff] %v1815_v0  ;;  %v843_v7 = vunpack.c.l.bf16 %v785_v63  ;;  %v845_v8 = vunpack.c.h.bf16 %v785_v63  ;;  %v775_v10 = vmax.f32 %v750_v1, 0.0  ;;  %v752_v11 = vadd.f32 %v751_v6, %v2793_v16  ;;  %1156 = vmatprep.mubr.bf16.mxu1 %v785_v63 }
 0x18d   : > { %v896_v15 = vsel %vm870_vm2, %v842_v3, 0.0  ;;  %v753_v18 = vpop.f32.mrf.mxu0  ;;  %1157 = vmatmul.mubr.bf16.gmra.mxu1 %v784_v60  ;;  %v898_v23 = vsel %vm871_vm3, %v844_v4, 0.0 }
 0x18e   : > { %v909_v19 = vadd.f32 %v908_v2, %v896_v15  ;;  %v897_v20 = vsel %vm870_vm2, %v843_v7, 0.0  ;;  %v1816_v21 = vpack.c.bf16 %v775_v10, %v774_v5  ;;  %v776_v25 = vmax.f32 %v752_v11, 0.0 }
 0x18f   : > { %v916_v24 = vadd.f32 %v915_v14, %v897_v20  ;;  %v754_v26 = vadd.f32 %v753_v18, %v2796_v17  ;;  %v757_v27 = vpop.f32.mrf.mxu0  ;;  %v899_v29 = vsel %vm871_vm3, %v845_v8, 0.0 }
 0x190   : > { %v910_v28 = vadd.f32 %v909_v19, %v898_v23  ;;  %834 = vst [vmem:[%s2808_s6 + $0x20] sm:$0xff] %v1816_v21  ;;  %v758_v32 = vadd.f32 %v757_v27, %v2793_v16  ;;  %v786_v35 = vpack.c.bf16 %v776_v25, %v774_v5 }
 0x191   : > { %v917_v34 = vadd.f32 %v916_v24, %v899_v29  ;;  %v777_v36 = vmax.f32 %v754_v26, 0.0  ;;  %v759_v37 = vpop.f32.mrf.mxu0 }
 0x192   : > { %v760_v38 = vadd.f32 %v759_v37, %v2796_v17  ;;  %v846_v39 = vunpack.c.l.bf16 %v786_v35  ;;  %v848_v40 = vunpack.c.h.bf16 %v786_v35  ;;  %v778_v46 = vmax.f32 %v758_v32, 0.0 }
 0x193   : > { %v787_v41 = vpack.c.bf16 %v777_v36, %v775_v10  ;;  %v1817_v42 = vpack.c.bf16 %v777_v36, %v776_v25  ;;  %v761_v45 = vpop.f32.mrf.mxu0 }
 0x194   : > { %v779_v47 = vmax.f32 %v760_v38, 0.0  ;;  %v762_v48 = vadd.f32 %v761_v45, %v2793_v16  ;;  %v900_v49 = vsel %vm872_vm4, %v846_v39, 0.0  ;;  %v902_v16 = vsel %vm873_vm5, %v848_v40, 0.0 }
 0x195   : > { %835 = vst [vmem:[%s2808_s6 + $0x28] sm:$0xff] %v1817_v42  ;;  %v847_v50 = vunpack.c.l.bf16 %v787_v41  ;;  %v849_v51 = vunpack.c.h.bf16 %v787_v41  ;;  %1166 = vmatprep.mubr.bf16.mxu1 %v787_v41  ;;  %v763_v53 = vpop.f32.mrf.mxu0  ;;  %v911_v54 = vadd.f32 %v910_v28, %v900_v49 }
 0x196   : > { %v1818_v55 = vpack.c.bf16 %v779_v47, %v778_v46  ;;  %v780_v56 = vmax.f32 %v762_v48, 0.0  ;;  %v764_v57 = vadd.f32 %v763_v53, %v2796_v17  ;;  %1167 = vmatmul.mubr.bf16.gmra.mxu1 %v786_v35 }
 0x197   : > { %v901_v58 = vsel %vm872_vm4, %v847_v50, 0.0  ;;  %v912_v60 = vadd.f32 %v911_v54, %v902_v16  ;;  %v903_v17 = vsel %vm873_vm5, %v849_v51, 0.0 }
 0x198   : > { %v918_v61 = vadd.f32 %v917_v34, %v901_v58  ;;  %836 = vst [vmem:[%s2808_s6 + $0x30] sm:$0xff] %v1818_v55  ;;  %v788_v62 = vpack.c.bf16 %v780_v56, %v778_v46  ;;  %v781_v63 = vmax.f32 %v764_v57, 0.0 }
 0x19a   : > { %v919_v0 = vadd.f32 %v918_v61, %v903_v17  ;;  %v850_v1 = vunpack.c.l.bf16 %v788_v62  ;;  %v852_v2 = vunpack.c.h.bf16 %v788_v62  ;;  %v789_v3 = vpack.c.bf16 %v781_v63, %v779_v47 }
 0x19b   : > { %v1819_v4 = vpack.c.bf16 %v781_v63, %v780_v56 }
 0x19c   : > { %v904_v5 = vsel %vm874_vm6, %v850_v1, 0.0  ;;  %v851_v6 = vunpack.c.l.bf16 %v789_v3  ;;  %v853_v7 = vunpack.c.h.bf16 %v789_v3  ;;  %1176 = vmatprep.mubr.bf16.mxu1 %v789_v3  ;;  %v906_v10 = vsel %vm875_vm7, %v852_v2, 0.0 }
 0x19d   : > { %v913_v8 = vadd.f32 %v912_v60, %v904_v5  ;;  %837 = vst [vmem:[%s2808_s6 + $0x38] sm:$0xff] %v1819_v4 }
 0x19e   : > { %v905_v11 = vsel %vm874_vm6, %v851_v6, 0.0  ;;  %1177 = vmatmul.mubr.bf16.gmra.mxu1 %v788_v62  ;;  %v907_v18 = vsel %vm875_vm7, %v853_v7, 0.0 }
 0x19f   : > { %v2911_v14 = vadd.f32 %v913_v8, %v906_v10  ;;  %v920_v15 = vadd.f32 %v919_v0, %v905_v11 }
 0x1a1   : > { %v2916_v19 = vadd.f32 %v920_v15, %v907_v18 }
 0x245   : > { %v1148_v20 = vpop.f32.mrf.mxu1 }
 0x247   : > { %v1150_v21 = vpop.f32.mrf.mxu1 }
 0x249   : > { %v1152_v23 = vpop.f32.mrf.mxu1 }
 0x24b   : > { %v1154_v24 = vpop.f32.mrf.mxu1 }
 0x24d   : > { %v1158_v25 = vpop.f32.mrf.mxu1 }
 0x24f   : > { %v1160_v26 = vpop.f32.mrf.mxu1 }
 0x251   : > { %v1162_v27 = vpop.f32.mrf.mxu1 }
 0x253   : > { %v1164_v28 = vpop.f32.mrf.mxu1 }
 0x256   : > { %v1168_v29 = vpop.f32.mrf.mxu1 }
 0x258   : > { %v1170_v32 = vpop.f32.mrf.mxu1 }
 0x25a   : > { %v1172_v34 = vpop.f32.mrf.mxu1 }
 0x25c   : > { %v1174_v35 = vpop.f32.mrf.mxu1 }
 0x25e   : > { %v2918_v36 = vpop.f32.mrf.mxu1 }
 0x260   : > { %v2920_v37 = vpop.f32.mrf.mxu1  ;;  %1190 = sbr.rel (%p1793_p4) target bundleno = 622 (0x26e), region = 56 }
 0x262   : > { %v2922_v38 = vpop.f32.mrf.mxu1 }
 0x264   : > { %v2924_v39 = vpop.f32.mrf.mxu1 }
 0x265   : > { %1191 = vst [vmem:[#allocation2 + $0x30] sm:$0xff] %v1148_v20  ;;  %1192 = vst [vmem:[#allocation2] sm:$0xff] %v1150_v21 }
 0x266   : > { %1193 = vst [vmem:[#allocation2 + $0x58] sm:$0xff] %v1152_v23  ;;  %1194 = vst [vmem:[#allocation2 + $0x18] sm:$0xff] %v1154_v24 }
 0x267   : > { %1195 = vst [vmem:[#allocation2 + $0x50] sm:$0xff] %v1158_v25  ;;  %1196 = vst [vmem:[#allocation2 + $0x68] sm:$0xff] %v1160_v26 }
 0x268   : > { %1197 = vst [vmem:[#allocation2 + $0x8] sm:$0xff] %v1162_v27  ;;  %1198 = vst [vmem:[#allocation2 + $0x48] sm:$0xff] %v1164_v28 }
 0x269   : > { %1199 = vst [vmem:[#allocation2 + $0x40] sm:$0xff] %v1168_v29  ;;  %1200 = vst [vmem:[#allocation2 + $0x20] sm:$0xff] %v1170_v32 }
 0x26a   : > { %1201 = vst [vmem:[#allocation2 + $0x10] sm:$0xff] %v1172_v34  ;;  %1202 = vst [vmem:[#allocation2 + $0x38] sm:$0xff] %v1174_v35 }
 0x26b   : > { %1203 = vst [vmem:[#allocation2 + $0x60] sm:$0xff] %v2918_v36  ;;  %1204 = vst [vmem:[#allocation2 + $0x70] sm:$0xff] %v2920_v37 }
 0x26c   : > { %1205 = vst [vmem:[#allocation2 + $0x78] sm:$0xff] %v2922_v38  ;;  %1206 = vst [vmem:[#allocation2 + $0x28] sm:$0xff] %v2924_v39 }
 0x26d   : > { %1207 = vst [vmem:[#allocation3 + $0x8] sm:$0xff] %v2911_v14  ;;  %1208 = vst [vmem:[#allocation3] sm:$0xff] %v2916_v19 }
 0x26e PF: > { %s3250_s26 = sld [smem:[#allocation21_spill]] }
 0x274   : > { %p1794_p7 = scmp.eq.s32.totalorder %s3250_s26, 0 }
 0x276   : > { %1212 = sbr.rel (%p1794_p7) target bundleno = 647 (0x287), region = 60 }
 0x27b   : > { %v1213_v40 = vld [vmem:[#allocation2 + $0x30] sm:$0xff]  ;;  %v1214_v41 = vld [vmem:[#allocation2] sm:$0xff]  ;;  %v1215_v42 = vld [vmem:[#allocation2 + $0x58] sm:$0xff] }
 0x27c   : > { %v1229_v45 = vadd.f32 %v1213_v40, %v1148_v20  ;;  %v1230_v46 = vadd.f32 %v1214_v41, %v1150_v21  ;;  %v1231_v47 = vadd.f32 %v1215_v42, %v1152_v23  ;;  %v1216_v48 = vld [vmem:[#allocation2 + $0x18] sm:$0xff]  ;;  %v1217_v49 = vld [vmem:[#allocation2 + $0x50] sm:$0xff]  ;;  %v1218_v50 = vld [vmem:[#allocation2 + $0x68] sm:$0xff] }
 0x27d   : > { %v1232_v51 = vadd.f32 %v1216_v48, %v1154_v24  ;;  %v1233_v53 = vadd.f32 %v1217_v49, %v1158_v25  ;;  %v1234_v54 = vadd.f32 %v1218_v50, %v1160_v26  ;;  %v1219_v55 = vld [vmem:[#allocation2 + $0x8] sm:$0xff]  ;;  %v1221_v57 = vld [vmem:[#allocation2 + $0x40] sm:$0xff]  ;;  %v1223_v62 = vld [vmem:[#allocation2 + $0x10] sm:$0xff] }
 0x27e   : > { %v1220_v56 = vld [vmem:[#allocation2 + $0x48] sm:$0xff]  ;;  %1245 = vst [vmem:[#allocation2 + $0x30] sm:$0xff] %v1229_v45  ;;  %1246 = vst [vmem:[#allocation2] sm:$0xff] %v1230_v46  ;;  %v1235_v16 = vadd.f32 %v1219_v55, %v1162_v27  ;;  %v1237_v60 = vadd.f32 %v1221_v57, %v1168_v29  ;;  %v1222_v61 = vld [vmem:[#allocation2 + $0x20] sm:$0xff]  ;;  %v1239_v0 = vadd.f32 %v1223_v62, %v1172_v34 }
 0x27f   : > { %1247 = vst [vmem:[#allocation2 + $0x58] sm:$0xff] %v1231_v47  ;;  %v1236_v58 = vadd.f32 %v1220_v56, %v1164_v28  ;;  %v1224_v63 = vld [vmem:[#allocation2 + $0x38] sm:$0xff]  ;;  %1248 = vst [vmem:[#allocation2 + $0x18] sm:$0xff] %v1232_v51  ;;  %v1238_v17 = vadd.f32 %v1222_v61, %v1170_v32  ;;  %v1225_v2 = vld [vmem:[#allocation2 + $0x60] sm:$0xff] }
 0x280   : > { %1249 = vst [vmem:[#allocation2 + $0x50] sm:$0xff] %v1233_v53  ;;  %1250 = vst [vmem:[#allocation2 + $0x68] sm:$0xff] %v1234_v54  ;;  %v1240_v1 = vadd.f32 %v1224_v63, %v1174_v35  ;;  %v1226_v3 = vld [vmem:[#allocation2 + $0x70] sm:$0xff]  ;;  %v1227_v4 = vld [vmem:[#allocation2 + $0x78] sm:$0xff]  ;;  %v1241_v5 = vadd.f32 %v1225_v2, %v2918_v36 }
 0x281   : > { %1251 = vst [vmem:[#allocation2 + $0x8] sm:$0xff] %v1235_v16  ;;  %1252 = vst [vmem:[#allocation2 + $0x48] sm:$0xff] %v1236_v58  ;;  %v1242_v6 = vadd.f32 %v1226_v3, %v2920_v37  ;;  %v1243_v7 = vadd.f32 %v1227_v4, %v2922_v38  ;;  %v1228_v8 = vld [vmem:[#allocation2 + $0x28] sm:$0xff]  ;;  %v1262_v11 = vld [vmem:[#allocation3] sm:$0xff] }
 0x282   : > { %1253 = vst [vmem:[#allocation2 + $0x40] sm:$0xff] %v1237_v60  ;;  %v1261_v10 = vld [vmem:[#allocation3 + $0x8] sm:$0xff]  ;;  %1254 = vst [vmem:[#allocation2 + $0x20] sm:$0xff] %v1238_v17  ;;  %v1244_v15 = vadd.f32 %v1228_v8, %v2924_v39  ;;  %v1264_v20 = vadd.f32 %v1262_v11, %v2916_v19 }
 0x283   : > { %1255 = vst [vmem:[#allocation2 + $0x10] sm:$0xff] %v1239_v0  ;;  %1256 = vst [vmem:[#allocation2 + $0x38] sm:$0xff] %v1240_v1  ;;  %v1263_v18 = vadd.f32 %v1261_v10, %v2911_v14 }
 0x284   : > { %1257 = vst [vmem:[#allocation2 + $0x60] sm:$0xff] %v1241_v5  ;;  %1258 = vst [vmem:[#allocation2 + $0x70] sm:$0xff] %v1242_v6 }
 0x285   : > { %1259 = vst [vmem:[#allocation2 + $0x78] sm:$0xff] %v1243_v7  ;;  %1260 = vst [vmem:[#allocation2 + $0x28] sm:$0xff] %v1244_v15 }
 0x286   : > { %1265 = vst [vmem:[#allocation3 + $0x8] sm:$0xff] %v1263_v18  ;;  %1266 = vst [vmem:[#allocation3] sm:$0xff] %v1264_v20 }
 0x287 PF: > { %s3251_s15 = sld [smem:[#allocation21_spill]] }
 0x28d   : > { %p1795_p0 = scmp.ne.s32.totalorder %s3251_s15, 1 }
 0x28e   : > { %s3252_s30 = sld [smem:[#allocation34_spill]] (!%p1795_p0) }
 0x28f   : > { %1270 = sbr.rel (%p1795_p0) target bundleno = 910 (0x38e), region = 64 }
 0x294   : > { %v1287_v21 = vld [vmem:[%s3252_s30] sm:$0x3]  ;;  %v1271_v24 = vld [vmem:[#allocation2 + $0x30] sm:$0xff]  ;;  %v1273_v29 = vld [vmem:[#allocation2 + $0x58] sm:$0xff] }
 0x295   : > { %v1288_v23 = vunpack.c.l.bf16 %v1287_v21  ;;  %v1272_v25 = vld [vmem:[#allocation2] sm:$0xff]  ;;  %v1324_v28 = vld [vmem:[%s2679_s18] sm:$0xff]  ;;  %v1325_v32 = vld [vmem:[%s2679_s18 + $0x8] sm:$0xff] }
 0x296   : > { %v1332_v36 = vunpack.c.l.bf16 %v1324_v28  ;;  %v1333_v37 = vunpack.c.h.bf16 %v1324_v28  ;;  %v1334_v39 = vunpack.c.l.bf16 %v1325_v32  ;;  %v1275_v40 = vld [vmem:[#allocation2 + $0x50] sm:$0xff]  ;;  %v1326_v41 = vld [vmem:[%s2679_s18 + $0x10] sm:$0xff]  ;;  %v1276_v47 = vld [vmem:[#allocation2 + $0x68] sm:$0xff] }
 0x297   : > { %v1293_v14 = vrot.slane %v1288_v23, %v2785_v12  ;;  %v1297_v19 = vrot.slane %v1288_v23, %v481_v13  ;;  %v1274_v13 = vld [vmem:[#allocation2 + $0x18] sm:$0xff]  ;;  %v1336_v49 = vunpack.c.l.bf16 %v1326_v41  ;;  %v1277_v51 = vld [vmem:[#allocation2 + $0x8] sm:$0xff]  ;;  %v1337_v54 = vunpack.c.h.bf16 %v1326_v41  ;;  %v1279_v17 = vld [vmem:[#allocation2 + $0x40] sm:$0xff] }
 0x298   : > { %v1327_v53 = vld [vmem:[%s2679_s18 + $0x18] sm:$0xff]  ;;  %v1328_v0 = vld [vmem:[%s2679_s18 + $0x20] sm:$0xff]  ;;  %v1280_v6 = vld [vmem:[#allocation2 + $0x20] sm:$0xff] }
 0x299   : > { %v2956_v26 = vrot.slane %v1293_v14, %v2785_v12  ;;  %v2959_v27 = vrot.slane %v1297_v19, %v2785_v12  ;;  %v1335_v12 = vunpack.c.h.bf16 %v1325_v32  ;;  %v1278_v58 = vld [vmem:[#allocation2 + $0x48] sm:$0xff]  ;;  %v1338_v61 = vunpack.c.l.bf16 %v1327_v53  ;;  %v1281_v18 = vld [vmem:[#allocation2 + $0x10] sm:$0xff]  ;;  %v1329_v20 = vld [vmem:[%s2679_s18 + $0x28] sm:$0xff] }
 0x29a   : > { %v1339_v4 = vunpack.c.h.bf16 %v1327_v53  ;;  %v1340_v10 = vunpack.c.l.bf16 %v1328_v0  ;;  %v1341_v19 = vunpack.c.h.bf16 %v1328_v0  ;;  %v1343_v43 = vunpack.c.h.bf16 %v1329_v20  ;;  %v1331_v53 = vld [vmem:[%s2679_s18 + $0x38] sm:$0xff]  ;;  %v1423_v52 = vld [vmem:[#allocation3] sm:$0xff] }
 0x29b   : > { %v1308_v34 = vadd.f32 %v2956_v26, %v1271_v24  ;;  %v1309_v35 = vadd.f32 %v2959_v27, %v1272_v25  ;;  %v1310_v38 = vadd.f32 %v2956_v26, %v1273_v29  ;;  %v1311_v42 = vadd.f32 %v2959_v27, %v1274_v13  ;;  %v1282_v25 = vld [vmem:[#allocation2 + $0x38] sm:$0xff]  ;;  %v1330_v13 = vld [vmem:[%s2679_s18 + $0x30] sm:$0xff] }
 0x29c   : > { %v1312_v48 = vadd.f32 %v2956_v26, %v1275_v40  ;;  %v1313_v55 = vadd.f32 %v2959_v27, %v1276_v47  ;;  %v1314_v60 = vadd.f32 %v2956_v26, %v1277_v51  ;;  %v1315_v3 = vadd.f32 %v2959_v27, %v1278_v58  ;;  %v1285_v51 = vld [vmem:[#allocation2 + $0x78] sm:$0xff]  ;;  %v1286_v58 = vld [vmem:[#allocation2 + $0x28] sm:$0xff] }
 0x29d   : > { %v1348_v45 = vsub.f32 %v1332_v36, %v1308_v34  ;;  %v1349_v46 = vsub.f32 %v1333_v37, %v1309_v35  ;;  %v1350_v50 = vsub.f32 %v1334_v39, %v1310_v38  ;;  %v1351_v56 = vsub.f32 %v1335_v12, %v1311_v42  ;;  %v1283_v37 = vld [vmem:[#allocation2 + $0x60] sm:$0xff]  ;;  %v1284_v12 = vld [vmem:[#allocation2 + $0x70] sm:$0xff] }
 0x29e   : > { %v1352_v62 = vsub.f32 %v1336_v49, %v1312_v48  ;;  %v1353_v5 = vsub.f32 %v1337_v54, %v1313_v55  ;;  %v1316_v8 = vadd.f32 %v2956_v26, %v1279_v17  ;;  %v1354_v11 = vsub.f32 %v1338_v61, %v1314_v60 }
 0x29f   : > { %v1364_v57 = vsel %vm868_vm0, %v1348_v45, 0.0  ;;  %v1365_v16 = vsel %vm868_vm0, %v1349_v46, 0.0  ;;  %v1366_v63 = vsel %vm869_vm1, %v1350_v50, 0.0  ;;  %v1367_v9 = vsel %vm869_vm1, %v1351_v56, 0.0 }
 0x2a0   : > { %v1380_v1 = vmul.f32 %v1364_v57, %v1364_v57  ;;  %v1381_v2 = vmul.f32 %v1365_v16, %v1365_v16  ;;  %v1382_v7 = vmul.f32 %v1366_v63, %v1366_v63  ;;  %v1368_v15 = vsel %vm870_vm2, %v1352_v62, 0.0 }
 0x2a1   : > { %v1383_v21 = vmul.f32 %v1367_v9, %v1367_v9  ;;  %v1317_v14 = vadd.f32 %v2959_v27, %v1280_v6  ;;  %v1355_v30 = vsub.f32 %v1339_v4, %v1315_v3  ;;  %v1369_v24 = vsel %vm870_vm2, %v1353_v5, 0.0 }
 0x2a2   : > { %v1396_v23 = vadd.f32 %v1381_v2, %v1380_v1  ;;  %v1384_v28 = vmul.f32 %v1368_v15, %v1368_v15  ;;  %v1318_v32 = vadd.f32 %v2956_v26, %v1281_v18  ;;  %v1342_v34 = vunpack.c.l.bf16 %v1329_v20 }
 0x2a3   : > { %v1356_v35 = vsub.f32 %v1340_v10, %v1316_v8  ;;  %v1370_v36 = vsel %vm871_vm3, %v1354_v11, 0.0  ;;  %v1385_v38 = vmul.f32 %v1369_v24, %v1369_v24  ;;  %v1319_v40 = vadd.f32 %v2959_v27, %v1282_v25 }
 0x2a4   : > { %v1397_v29 = vadd.f32 %v1396_v23, %v1382_v7  ;;  %v1357_v41 = vsub.f32 %v1341_v19, %v1317_v14  ;;  %v1371_v42 = vsel %vm871_vm3, %v1355_v30, 0.0  ;;  %v1386_v45 = vmul.f32 %v1370_v36, %v1370_v36 }
 0x2a5   : > { %v1320_v47 = vadd.f32 %v2956_v26, %v1283_v37  ;;  %v1344_v48 = vunpack.c.l.bf16 %v1330_v13  ;;  %v1358_v49 = vsub.f32 %v1342_v34, %v1318_v32  ;;  %v1372_v50 = vsel %vm872_vm4, %v1356_v35, 0.0 }
 0x2a6   : > { %v1398_v39 = vadd.f32 %v1397_v29, %v1383_v21  ;;  %v1387_v54 = vmul.f32 %v1371_v42, %v1371_v42  ;;  %v1321_v56 = vadd.f32 %v2959_v27, %v1284_v12  ;;  %v1345_v57 = vunpack.c.h.bf16 %v1330_v13 }
 0x2a7   : > { %v1359_v44 = vsub.f32 %v1343_v43, %v1319_v40  ;;  %v1373_v16 = vsel %vm872_vm4, %v1357_v41, 0.0  ;;  %v1388_v60 = vmul.f32 %v1372_v50, %v1372_v50  ;;  %v1322_v62 = vadd.f32 %v2956_v26, %v1285_v51 }
 0x2a8   : > { %v1399_v46 = vadd.f32 %v1398_v39, %v1384_v28  ;;  %v1346_v63 = vunpack.c.l.bf16 %v1331_v53  ;;  %v1360_v17 = vsub.f32 %v1344_v48, %v1320_v47  ;;  %v1374_v0 = vsel %vm873_vm5, %v1358_v49, 0.0  ;;  %v1422_v28 = vld [vmem:[#allocation3 + $0x8] sm:$0xff] }
 0x2a9   : > { %v1389_v1 = vmul.f32 %v1373_v16, %v1373_v16  ;;  %v1323_v3 = vadd.f32 %v2959_v27, %v1286_v58  ;;  %v1347_v4 = vunpack.c.h.bf16 %v1331_v53  ;;  %v1361_v5 = vsub.f32 %v1345_v57, %v1321_v56 }
 0x2aa   : > { %v1400_v55 = vadd.f32 %v1399_v46, %v1385_v38  ;;  %v1375_v22 = vsel %vm873_vm5, %v1359_v44, 0.0  ;;  %v1390_v9 = vmul.f32 %v1374_v0, %v1374_v0  ;;  %v1362_v7 = vsub.f32 %v1346_v63, %v1322_v62 }
 0x2ab   : > { %v1376_v26 = vsel %vm874_vm6, %v1360_v17, 0.0  ;;  %v1391_v8 = vmul.f32 %v1375_v22, %v1375_v22  ;;  %v1363_v11 = vsub.f32 %v1347_v4, %v1323_v3  ;;  %v1377_v27 = vsel %vm874_vm6, %v1361_v5, 0.0 }
 0x2ac   : > { %v1401_v61 = vadd.f32 %v1400_v55, %v1386_v45  ;;  %v1392_v15 = vmul.f32 %v1376_v26, %v1376_v26  ;;  %v1378_v31 = vsel %vm875_vm7, %v1362_v7, 0.0  ;;  %v1393_v20 = vmul.f32 %v1377_v27, %v1377_v27 }
 0x2ad   : > { %v1379_v23 = vsel %vm875_vm7, %v1363_v11, 0.0  ;;  %v1394_v14 = vmul.f32 %v1378_v31, %v1378_v31  ;;  %v1424_v32 = vadd.f32 %v1423_v52, %v1422_v28 }
 0x2ae   : > { %v1402_v2 = vadd.f32 %v1401_v61, %v1387_v54  ;;  %v1395_v30 = vmul.f32 %v1379_v23, %v1379_v23 }
 0x2b0   : > { %v1403_v6 = vadd.f32 %v1402_v2, %v1388_v60 }
 0x2b2   : > { %v1404_v10 = vadd.f32 %v1403_v6, %v1389_v1 }
 0x2b4   : > { %v1405_v18 = vadd.f32 %v1404_v10, %v1390_v9 }
 0x2b6   : > { %v1406_v21 = vadd.f32 %v1405_v18, %v1391_v8 }
 0x2b8   : > { %v1407_v19 = vadd.f32 %v1406_v21, %v1392_v15 }
 0x2ba   : > { %v1408_v24 = vadd.f32 %v1407_v19, %v1393_v20 }
 0x2bc   : > { %v1409_v25 = vadd.f32 %v1408_v24, %v1394_v14 }
 0x2be   : > { %v1410_v29 = vadd.f32 %v1409_v25, %v1395_v30 }
 0x2c0   : > { %1411 = vadd.xlane.f32.xlu0 %v1410_v29 }
 0x2c4   : > { %1425 = vadd.xlane.f32.xlu0 %v1424_v32 }
 0x349   : > { %v1412_v34 = vpop.xlane.xlu0 %1411 }
 0x34a   : > { %v1413_v35 = vrot.slane %v1412_v34, 4 }
 0x34c   : > { %v1414_v36 = vadd.f32 %v1413_v35, %v1412_v34 }
 0x34d   : > { %v1426_v37 = vpop.xlane.xlu0 %1425 }
 0x34e   : > { %v1415_v13 = vrot.slane %v1414_v36, 2  ;;  %v1427_v38 = vrot.slane %v1426_v37, 4 }
 0x350   : > { %v1428_v33 = vadd.f32 %v1427_v38, %v1426_v37  ;;  %v1416_v59 = vadd.f32 %v1415_v13, %v1414_v36 }
 0x352   : > { %v1429_v39 = vrot.slane %v1428_v33, 2  ;;  %v1417_v40 = vrot.slane %v1416_v59, 1 }
 0x354   : > { %v1430_v43 = vadd.f32 %v1429_v39, %v1428_v33  ;;  %v1418_v41 = vadd.f32 %v1417_v40, %v1416_v59 }
 0x356   : > { %1821 = vpush %v1418_v41  ;;  %v1431_v42 = vrot.slane %v1430_v43, 1 }
 0x358   : > { %v1432_v12 = vadd.f32 %v1431_v42, %v1430_v43 }
 0x35a   : > { %1823 = vpush %v1432_v12 }
 0x387   : > { %s1822_s18 = spop %1821 }
 0x388   : > { %v1420_v45 = vstv %s1822_s18 }
 0x389   : > { %1421 = vst [vmem:[%s2928_s12] sm:$0xff] %v1420_v45 }
 0x38b   : > { %s1824_s23 = spop %1823 }
 0x38c   : > { %v1434_v46 = vstv %s1824_s23 }
 0x38d   : > { %1435 = vst [vmem:[%s2932_s17] sm:$0xff] %v1434_v46 }
 0x38e PF: > { %s3253_s1 = sld [smem:[#allocation22_spill]]  ;;  %s1479_s11 = sshll.u32 %s2928_s12, 4  ;;  %s1480_s11 = int_to_ptr.vmem [resolvable:$true] %s1479_s11 }
 0x38f   : > { %s3254_s13 = sld [smem:[#allocation36_spill]]  ;;  %s3044_s26 = scalar_lea.sflag [#allocation12], %s354_s0 }
 0x390   : > { %s2169_s15 = scalar_lea.vmem %s1480_s11, 128  ;;  %s2381_s16 = smov [#allocation11]  }
 0x391   : > { %p2170_p9 = scmp.ne.s32.totalorder %s1480_s11, %s2169_s15  ;;  %s2173_s22 = sshll.u32 %s2381_s16, 4  ;;  %s2174_s22 = int_to_ptr.vmem [resolvable:$false] %s2173_s22 }
 0x392   : > { %s2175_s30 = scalar_lea.vmem %s2174_s22, 256  ;;  %p2176_p12 = scmp.lt.s32.totalorder %s1480_s11, %s2174_s22 }
 0x393   : > { %p2171_p11 = pnand %p2170_p9, %p2623_p5  ;;  %p2177_p8 = scmp.lt.s32.totalorder %s2175_s30, %s2169_s15 }
 0x394   : > { %s1803_s19 = sshll.u32 %s3253_s1, 7 }
 0x395   : > { %s3255_s20 = smov %s3254_s13  ;;  %s1477_s10 = scalar_lea.hbm %s3254_s13, %s1803_s19 }
 0x396   : > { %p2172_p13 = pneg %p2171_p11  ;;  %p2178_p2 = por %p2177_p8, %p2176_p12 }
 0x398   : > { %p2179_p6 = pnand %p2178_p2, %p2172_p13 }
 0x39a   : > { %2182 = shalt.err (!%p2179_p6)
}
 0x39b   : > { %s2183_s18 = scalar_lea.hbm %s1477_s10, 128  ;;  %s2187_s12 = scalar_lea.hbm %s3255_s20, 256 }
 0x39c   : > { %p2184_p10 = scmp.ne.s32.totalorder %s1477_s10, %s2183_s18  ;;  %p2188_p7 = scmp.lt.s32.totalorder %s1477_s10, %s3255_s20 }
 0x39d   : > { %p2189_p0 = scmp.lt.s32.totalorder %s2187_s12, %s2183_s18 }
 0x39e   : > { %p2185_p1 = pnand %p2184_p10, %p2623_p5 }
 0x39f   : > { %p2190_p9 = por %p2189_p0, %p2188_p7 }
 0x3a0   : > { %p2186_p4 = pneg %p2185_p1 }
 0x3a2   : > { %p2191_p11 = pnand %p2190_p9, %p2186_p4 }
 0x3a4   : > { %2194 = shalt.err (!%p2191_p11)
}
 0x3a5   : > { %1832 = dma.vmem_to_hbm [thread:$0]  (%p2623_p5), %s1480_s11, 128, %s1477_s10, %s3044_s26  }
 0x3a6   : > { %s1820_s29 = sshll.u32 %s3253_s1, 5  ;;  %s1463_s13 = sshll.u32 %s2808_s6, 4  ;;  %s3062_s13 = int_to_ptr.vmem [resolvable:$true] %s1463_s13 }
 0x3a7   : > { %s1460_s15 = sadd.s32 %s1820_s29, %s2775_s27  ;;  %s3256_s18 = sld [smem:[#allocation35_spill]] }
 0x3a8   : > { %s1802_s16 = sshll.u32 %s1460_s15, 6  ;;  %s3257_s23 = sld [smem:[#allocation37_spill]] }
 0x3a9   : > { %s3078_s6 = scalar_lea.sflag [#allocation6], %s405_s9  ;;  %s2195_s27 = scalar_lea.vmem %s3062_s13, 1024 }
 0x3aa   : > { %p2196_p13 = scmp.ne.s32.totalorder %s3062_s13, %s2195_s27  ;;  %s2382_s10 = smov [#allocation10]  }
 0x3ab   : > { %s2199_s11 = sshll.u32 %s2382_s10, 4  ;;  %s2200_s11 = int_to_ptr.vmem [resolvable:$false] %s2199_s11 }
 0x3ac   : > { %p2197_p12 = pnand %p2196_p13, %p2612_p3  ;;  %s2201_s29 = scalar_lea.vmem %s2200_s11, 2048 }
 0x3ad   : > { %s3067_s21 = scalar_lea.hbm %s3256_s18, %s1802_s16  ;;  %p2202_p2 = scmp.lt.s32.totalorder %s3062_s13, %s2200_s11 }
 0x3ae   : > { %s3074_s3 = scalar_lea.hbm %s3257_s23, %s1803_s19  ;;  %p2198_p8 = pneg %p2197_p12 }
 0x3af   : > { %p2203_p6 = scmp.lt.s32.totalorder %s2201_s29, %s2195_s27 }
 0x3b1   : > { %p2204_p10 = por %p2203_p6, %p2202_p2 }
 0x3b3   : > { %p2205_p1 = pnand %p2204_p10, %p2198_p8 }
 0x3b5   : > { %2208 = shalt.err (!%p2205_p1)
}
 0x3b6   : > { %s2209_s9 = scalar_lea.hbm %s3067_s21, 1024  ;;  %s2213_s15 = scalar_lea.hbm %s3256_s18, 4096 }
 0x3b7   : > { %p2210_p4 = scmp.ne.s32.totalorder %s3067_s21, %s2209_s9  ;;  %p2214_p9 = scmp.lt.s32.totalorder %s3067_s21, %s3256_s18 }
 0x3b8   : > { %p2215_p11 = scmp.lt.s32.totalorder %s2213_s15, %s2209_s9 }
 0x3b9   : > { %p2211_p7 = pnand %p2210_p4, %p2612_p3 }
 0x3ba   : > { %p2216_p13 = por %p2215_p11, %p2214_p9 }
 0x3bb   : > { %p2212_p0 = pneg %p2211_p7 }
 0x3bd   : > { %p2217_p12 = pnand %p2216_p13, %p2212_p0 }
 0x3bf   : > { %2220 = shalt.err (!%p2217_p12)
}
 0x3c0   : > { %s2383_s30 = smov 128   ;;  %s2384_s0 = smov 256  }
 0x3c1   : > { %s2385_s12 = smov 8   ;;  %s1492_s27 = sshll.u32 %s2932_s17, 4  ;;  %s1493_s27 = int_to_ptr.vmem [resolvable:$true] %s1492_s27 }
 0x3c2   : > { %1831 = dma.vmem_to_hbm [thread:$0]  (%p2612_p3), %s3062_s13, 1024, %s3067_s21, %s3078_s6, %s2383_s30, %s2384_s0, %s2385_s12  }
 0x3c3   : > { %s2221_s10 = scalar_lea.vmem %s1493_s27, 128  ;;  %s2386_s11 = smov [#allocation13]  }
 0x3c4   : > { %p2222_p8 = scmp.ne.s32.totalorder %s1493_s27, %s2221_s10  ;;  %s2225_s29 = sshll.u32 %s2386_s11, 4  ;;  %s2226_s29 = int_to_ptr.vmem [resolvable:$false] %s2225_s29 }
 0x3c5   : > { %s2227_s9 = scalar_lea.vmem %s2226_s29, 256  ;;  %p2228_p10 = scmp.lt.s32.totalorder %s1493_s27, %s2226_s29 }
 0x3c6   : > { %p2223_p2 = pnand %p2222_p8, %p2623_p5  ;;  %p2229_p1 = scmp.lt.s32.totalorder %s2227_s9, %s2221_s10 }
 0x3c8   : > { %p2224_p6 = pneg %p2223_p2  ;;  %p2230_p4 = por %p2229_p1, %p2228_p10 }
 0x3ca   : > { %p2231_p7 = pnand %p2230_p4, %p2224_p6 }
 0x3cc   : > { %2234 = shalt.err (!%p2231_p7)
}
 0x3cd   : > { %s2235_s5 = scalar_lea.hbm %s3074_s3, 128  ;;  %s2239_s21 = scalar_lea.hbm %s3257_s23, 256 }
 0x3ce   : > { %p2236_p3 = scmp.ne.s32.totalorder %s3074_s3, %s2235_s5  ;;  %p2240_p11 = scmp.lt.s32.totalorder %s3074_s3, %s3257_s23 }
 0x3cf   : > { %p2241_p13 = scmp.lt.s32.totalorder %s2239_s21, %s2235_s5 }
 0x3d0   : > { %p2237_p0 = pnand %p2236_p3, %p2623_p5 }
 0x3d1   : > { %p2242_p12 = por %p2241_p13, %p2240_p11 }
 0x3d2   : > { %p2238_p9 = pneg %p2237_p0 }
 0x3d4   : > { %p2243_p8 = pnand %p2242_p12, %p2238_p9 }
 0x3d6   : > { %2246 = shalt.err (!%p2243_p8)
}
 0x3d7   : > { %1833 = dma.vmem_to_hbm [thread:$0]  (%p2623_p5), %s1493_s27, 128, %s3074_s3, %s3044_s26  }
 0x3d8 PF: > { %p1858_p2 = scmp.ge.s32.totalorder %s2373_s14, 2  ;;  %s1504_s19 = sand.u32 1, %s2321_s24  }
 0x3d9   : > { %p3258_p6 = scmp.ne.s32.totalorder %s3236_s7, 0  ;;  %s1505_s15 = scalar_lea.sflag [#allocation6], %s1504_s19 }
 0x3db   : > { %p1848_p10 = pnand %p1858_p2, %p3258_p6 }
 0x3dd   : > { %p1849_p1 = pneg %p1848_p10 }
 0x3df   : > { %2312 = dma.done.wait (%p1849_p1), %s1505_s15, 1024  }
 0x3e0   : > { %2314 = vsyncadd (%p1849_p1), %s1505_s15, 4294966272  ;;  %s3259_s16 = sadd.s32 4294967294, %s2373_s14   ;;  %s3260_s22 = sld [smem:[#allocation30_spill]] }
 0x3e1   : > { %s1513_s30 = sand.u32 1, %s3259_s16  }
 0x3e2   : > { %s1514_s4 = scalar_lea.sflag [#allocation12], %s1513_s30 }
 0x3e6   : > { %p3261_p4 = scmp.ne.s32.totalorder %s3260_s22, 0 }
 0x3e8   : > { %p1851_p7 = pnand %p1858_p2, %p3261_p4 }
 0x3ea   : > { %p1852_p3 = pneg %p1851_p7 }
 0x3ec   : > { %2316 = dma.done.wait (%p1852_p3), %s1514_s4, 256  }
 0x3ed   : > { %2318 = vsyncadd (%p1852_p3), %s1514_s4, 4294967040  ;;  %s30_s14 = sadd.s32 1, %s2373_s14   ;;  %s3263_s7 = sld [smem:[#allocation18_spill]] }
 0x3ee   : > { %p3128_p5 = scmp.ge.s32.totalorder %s30_s14, 6   ;;  %s3264_s26 = sld [smem:[#allocation29_spill]] }
 0x3ef   : > { %s3265_s3 = sld [smem:[#allocation19_spill]]  ;;  %s3274_s24 = smov %s2325_s25 }
 0x3f0   : > { %s3266_s29 = sld [smem:[#allocation27_spill]]  ;;  %s3276_s27 = smov %s2337_s28 }
 0x3f1   : > { %s3267_s0 = sld [smem:[#allocation20_spill]]  ;;  %s3278_s30 = smov %s2349_s8 }
 0x3f2   : > { %s3268_s9 = sld [smem:[#allocation28_spill]] }
 0x3f3   : > { %s3269_s10 = sld [smem:[#allocation23_spill]]  ;;  %s3275_s25 = smov %s3263_s7 }
 0x3f4   : > { %s3270_s11 = sld [smem:[#allocation24_spill]]  ;;  %29 = sbr.rel (!%p3128_p5) target bundleno = 22 (0x16), region = 156 }
 0x3f5   : > { %s3271_s12 = sld [smem:[#allocation25_spill]]  ;;  %s3277_s28 = smov %s3265_s3 }
 0x3f6   : > { %s3272_s13 = sld [smem:[#allocation26_spill]] }
 0x3f7   : > { %s3279_s8 = smov %s3267_s0 }
 0x3f9   :  { %1528 = vsyncpa [#allocation5], 1 }
 0x3fa   :  { %1530 = vsyncpa [#allocation5 + $0x1], 1 }
 0x3fb   :  { %1531 = vsyncpa [#allocation8], 1 }
 0x3fc   :  { %1533 = vsyncpa [#allocation8 + $0x1], 1 }
 0x3fd   :  { %1534 = vsyncpa [#allocation6], 1 }
 0x3fe   :  { %1536 = vsyncpa [#allocation6 + $0x1], 1 }
 0x3ff   :  { %1537 = vsyncpa [#allocation12], 1 }
 0x400   :  { %1539 = vsyncpa [#allocation12 + $0x1], 1 }

</bundles_post_ra>
